<compile_context>
chip_gen: v5e
topology: v5e:2x2
jax: 0.10.0
libtpu: 0.0.40
codegen_flags: <defaults>
</compile_context>

<pallas_src>
import functools

import jax
import jax.numpy as jnp
from jax.experimental import pallas as pl


# ----------------------------------------------------------------------------
# Fused kernel
# ----------------------------------------------------------------------------
def _fused_kernel(xp_ref, w0_ref, w1_ref, w2_ref, cb_ref, *rest,
                  n_layers, hidden, pool):
    lstm_refs = rest[:3 * n_layers]
    fcw_ref, fcb_ref, o_ref = rest[3 * n_layers:]

    B, Tpad, D = xp_ref.shape
    T = Tpad - 2                                   # wrapper pads time by 1|1
    Tp = T // pool
    M = hidden

    xp = xp_ref[...].astype(jnp.float32)           # (B, T+2, D)

    # ------------- Conv1d(kernel=3, padding=1): 3 shifted matmuls -----------
    x_prev = xp[:, 0:T, :].reshape(B * T, D)       # x[t-1]
    x_mid = xp[:, 1:T + 1, :].reshape(B * T, D)    # x[t]
    x_next = xp[:, 2:T + 2, :].reshape(B * T, D)   # x[t+1]
    conv = (jnp.dot(x_prev, w0_ref[...], preferred_element_type=jnp.float32)
            + jnp.dot(x_mid, w1_ref[...], preferred_element_type=jnp.float32)
            + jnp.dot(x_next, w2_ref[...], preferred_element_type=jnp.float32)
            + cb_ref[...])                         # (B*T, C), batch-major rows

    # ------------- MaxPool1d(kernel=2, stride=2) over time ------------------
    C = conv.shape[-1]
    pooled = jnp.max(conv.reshape(B * Tp, pool, C), axis=1)   # (B*Tp, C)

    # ------------- hoisted layer-0 input projection --------------------------
    wih0, whh0_ref, b0 = lstm_refs[0], lstm_refs[1], lstm_refs[2]
    zx0 = (jnp.dot(pooled, wih0[...], preferred_element_type=jnp.float32)
           + b0[...]).reshape(B, Tp, 4 * M)        # (B, Tp, 4M)

    whh = [lstm_refs[3 * l + 1][...] for l in range(n_layers)]      # (M, 4M)
    wih = [None] + [lstm_refs[3 * l][...] for l in range(1, n_layers)]
    bias = [None] + [lstm_refs[3 * l + 2][...] for l in range(1, n_layers)]

    h = [jnp.zeros((B, M), jnp.float32) for _ in range(n_layers)]
    c = [jnp.zeros((B, M), jnp.float32) for _ in range(n_layers)]

    def lstm_cell(z, c_prev):                      # PyTorch gate order i,f,g,o
        sig = jax.nn.sigmoid(z)                    # one full-width EUP pass
        i_g = sig[:, 0 * M:1 * M]
        f_g = sig[:, 1 * M:2 * M]
        o_g = sig[:, 3 * M:4 * M]
        g_g = jnp.tanh(z[:, 2 * M:3 * M])
        c_new = f_g * c_prev + i_g * g_g
        h_new = o_g * jnp.tanh(c_new)
        return h_new, c_new

    # ------------- single fully-unrolled time loop, layers interleaved ------
    for t in range(Tp):
        for l in range(n_layers):
            if l == 0:
                z = zx0[:, t, :] + jnp.dot(h[0], whh[0],
                                           preferred_element_type=jnp.float32)
            else:
                z = (jnp.dot(h[l - 1], wih[l],
                             preferred_element_type=jnp.float32)
                     + bias[l]
                     + jnp.dot(h[l], whh[l],
                               preferred_element_type=jnp.float32))
            h[l], c[l] = lstm_cell(z, c[l])

    # ------------- fc(hn[-1]) ------------------------------------------------
    o_ref[...] = (jnp.dot(h[n_layers - 1], fcw_ref[...],
                          preferred_element_type=jnp.float32)
                  + fcb_ref[...]).astype(o_ref.dtype)


# ----------------------------------------------------------------------------
# Wrapper: weight re-layout + single pallas_call (no grid)
# ----------------------------------------------------------------------------
def conv_lstm_classifier_forward(x, params, pool=2):
    B, T, D = x.shape
    conv_w = params["conv_w"]                      # (C, D, 3) PyTorch layout
    C = conv_w.shape[0]
    M = params["nHidden"]
    K = params["fc_w"].shape[0]
    n_layers = len(params["lstm"])
    assert conv_w.shape[2] == 3 and T % pool == 0

    xp = jnp.pad(x, ((0, 0), (1, 1), (0, 0)))      # conv time padding (prep only)
    w_taps = jnp.transpose(conv_w, (2, 1, 0))      # (3, D, C): one matrix / tap

    args = [xp, w_taps[0], w_taps[1], w_taps[2],
            params["conv_b"].reshape(1, C)]
    for (w_ih, w_hh, b_ih, b_hh) in params["lstm"]:
        args += [jnp.transpose(w_ih),              # (I, 4M)
                 jnp.transpose(w_hh),              # (M, 4M)
                 (b_ih + b_hh).reshape(1, 4 * M)]
    args += [jnp.transpose(params["fc_w"]),        # (M, K)
             params["fc_b"].reshape(1, K)]

    kernel = functools.partial(_fused_kernel, n_layers=n_layers,
                               hidden=M, pool=pool)
    return pl.pallas_call(
        kernel,
        out_shape=jax.ShapeDtypeStruct((B, K), x.dtype),
    )(*args)


# ----------------------------------------------------------------------------
# Pure-JAX reference (mirrors the PyTorch module semantics)
# ----------------------------------------------------------------------------
def reference_forward(x, params):
    w, b = params["conv_w"], params["conv_b"]
    B, T, D = x.shape
    xp = jnp.pad(x, ((0, 0), (1, 1), (0, 0)))
    conv = (jnp.einsum("btd,cd->btc", xp[:, 0:T, :], w[:, :, 0])
            + jnp.einsum("btd,cd->btc", xp[:, 1:T + 1, :], w[:, :, 1])
            + jnp.einsum("btd,cd->btc", xp[:, 2:T + 2, :], w[:, :, 2])) + b
    pooled = jnp.max(conv.reshape(B, T // 2, 2, -1), axis=2)

    M = params["nHidden"]
    h_seq = pooled
    for (w_ih, w_hh, b_ih, b_hh) in params["lstm"]:
        Bc, Tc, _ = h_seq.shape
        h = jnp.zeros((Bc, M), jnp.float32)
        c = jnp.zeros((Bc, M), jnp.float32)
        outs = []
        for t in range(Tc):
            z = h_seq[:, t, :] @ w_ih.T + h @ w_hh.T + b_ih + b_hh
            i_g = jax.nn.sigmoid(z[:, :M])
            f_g = jax.nn.sigmoid(z[:, M:2 * M])
            g_g = jnp.tanh(z[:, 2 * M:3 * M])
            o_g = jax.nn.sigmoid(z[:, 3 * M:])
            c = f_g * c + i_g * g_g
            h = o_g * jnp.tanh(c)
            outs.append(h)
        h_seq = jnp.stack(outs, axis=1)
    return h_seq[:, -1, :] @ params["fc_w"].T + params["fc_b"]


if __name__ == "__main__":
    B, T = 2, 16
    nInputs, nHidden, nLayers, nOutput = 4, 32, 2, 8
    convOutChannels = 32

    key = jax.random.PRNGKey(0)
    keys = jax.random.split(key, 16)

    params = {
        "nHidden": nHidden,
        "conv_w": 0.2 * jax.random.normal(
            keys[0], (convOutChannels, nInputs, 3), jnp.float32),
        "conv_b": 0.1 * jax.random.normal(
            keys[1], (convOutChannels,), jnp.float32),
        "fc_w": 0.2 * jax.random.normal(keys[2], (nOutput, nHidden), jnp.float32),
        "fc_b": 0.1 * jax.random.normal(keys[3], (nOutput,), jnp.float32),
        "lstm": [],
    }
    for layer in range(nLayers):
        in_size = convOutChannels if layer == 0 else nHidden
        k = jax.random.split(keys[4 + layer], 4)
        params["lstm"].append((
            0.2 * jax.random.normal(k[0], (4 * nHidden, in_size), jnp.float32),
            0.2 * jax.random.normal(k[1], (4 * nHidden, nHidden), jnp.float32),
            0.1 * jax.random.normal(k[2], (4 * nHidden,), jnp.float32),
            0.1 * jax.random.normal(k[3], (4 * nHidden,), jnp.float32),
        ))

    x = jax.random.normal(keys[10], (B, T, nInputs), jnp.float32)

    out = jax.block_until_ready(conv_lstm_classifier_forward(x, params))
    ref = jax.block_until_ready(reference_forward(x, params))

    assert out.shape == (B, nOutput)
    assert jnp.allclose(out, ref, atol=1e-3, rtol=1e-3), (
        f"mismatch: max abs err {jnp.max(jnp.abs(out - ref))}")

    print("KERNEL_OK")
</pallas_src>

<mosaic_0001>
module attributes {stable_mosaic.version = 11 : i64} {
  func.func @_fused_kernel(%arg0: memref<2x18x4xf32, #tpu.memory_space<vmem>>, %arg1: memref<4x32xf32, #tpu.memory_space<vmem>>, %arg2: memref<4x32xf32, #tpu.memory_space<vmem>>, %arg3: memref<4x32xf32, #tpu.memory_space<vmem>>, %arg4: memref<1x32xf32, #tpu.memory_space<vmem>>, %arg5: memref<32x128xf32, #tpu.memory_space<vmem>>, %arg6: memref<32x128xf32, #tpu.memory_space<vmem>>, %arg7: memref<1x128xf32, #tpu.memory_space<vmem>>, %arg8: memref<32x128xf32, #tpu.memory_space<vmem>>, %arg9: memref<32x128xf32, #tpu.memory_space<vmem>>, %arg10: memref<1x128xf32, #tpu.memory_space<vmem>>, %arg11: memref<32x8xf32, #tpu.memory_space<vmem>>, %arg12: memref<1x8xf32, #tpu.memory_space<vmem>>, %arg13: memref<2x8xf32, #tpu.memory_space<vmem>>) attributes {dimension_semantics = [], scalar_prefetch = 0 : i64, scratch_operands = 0 : i64, tpu.core_type = #tpu.core_type<tc>} {
    %c0 = arith.constant 0 : index
    %c0_0 = arith.constant 0 : index
    %c0_1 = arith.constant 0 : index
    %0 = vector.load %arg0[%c0, %c0_0, %c0_1] : memref<2x18x4xf32, #tpu.memory_space<vmem>>, vector<2x18x4xf32>
    %1 = vector.extract_strided_slice %0 {offsets = [0, 0, 0], sizes = [2, 16, 4], strides = [1, 1, 1]} : vector<2x18x4xf32> to vector<2x16x4xf32>
    %2 = vector.shape_cast %1 : vector<2x16x4xf32> to vector<32x4xf32>
    %3 = vector.extract_strided_slice %0 {offsets = [0, 1, 0], sizes = [2, 16, 4], strides = [1, 1, 1]} : vector<2x18x4xf32> to vector<2x16x4xf32>
    %4 = vector.shape_cast %3 : vector<2x16x4xf32> to vector<32x4xf32>
    %5 = vector.extract_strided_slice %0 {offsets = [0, 2, 0], sizes = [2, 16, 4], strides = [1, 1, 1]} : vector<2x18x4xf32> to vector<2x16x4xf32>
    %6 = vector.shape_cast %5 : vector<2x16x4xf32> to vector<32x4xf32>
    %c0_2 = arith.constant 0 : index
    %c0_3 = arith.constant 0 : index
    %7 = vector.load %arg1[%c0_2, %c0_3] : memref<4x32xf32, #tpu.memory_space<vmem>>, vector<4x32xf32>
    %cst = arith.constant dense<0.000000e+00> : vector<32x32xf32>
    %8 = tpu.matmul %2, %7, %cst {dimension_numbers = #tpu.dot_dimension_numbers<[1], [0], [0], [1], [0, 0, 1, 1], [], []>} : vector<32x4xf32>, vector<4x32xf32>, vector<32x32xf32> -> vector<32x32xf32>
    %c0_4 = arith.constant 0 : index
    %c0_5 = arith.constant 0 : index
    %9 = vector.load %arg2[%c0_4, %c0_5] : memref<4x32xf32, #tpu.memory_space<vmem>>, vector<4x32xf32>
    %cst_6 = arith.constant dense<0.000000e+00> : vector<32x32xf32>
    %10 = tpu.matmul %4, %9, %cst_6 {dimension_numbers = #tpu.dot_dimension_numbers<[1], [0], [0], [1], [0, 0, 1, 1], [], []>} : vector<32x4xf32>, vector<4x32xf32>, vector<32x32xf32> -> vector<32x32xf32>
    %11 = arith.addf %8, %10 : vector<32x32xf32>
    %c0_7 = arith.constant 0 : index
    %c0_8 = arith.constant 0 : index
    %12 = vector.load %arg3[%c0_7, %c0_8] : memref<4x32xf32, #tpu.memory_space<vmem>>, vector<4x32xf32>
    %cst_9 = arith.constant dense<0.000000e+00> : vector<32x32xf32>
    %13 = tpu.matmul %6, %12, %cst_9 {dimension_numbers = #tpu.dot_dimension_numbers<[1], [0], [0], [1], [0, 0, 1, 1], [], []>} : vector<32x4xf32>, vector<4x32xf32>, vector<32x32xf32> -> vector<32x32xf32>
    %14 = arith.addf %11, %13 : vector<32x32xf32>
    %c0_10 = arith.constant 0 : index
    %c0_11 = arith.constant 0 : index
    %15 = vector.load %arg4[%c0_10, %c0_11] : memref<1x32xf32, #tpu.memory_space<vmem>>, vector<1x32xf32>
    %16 = vector.broadcast %15 : vector<1x32xf32> to vector<32x32xf32>
    %17 = arith.addf %14, %16 : vector<32x32xf32>
    %18 = vector.shape_cast %17 : vector<32x32xf32> to vector<16x2x32xf32>
    %cst_12 = arith.constant dense<0xFF800000> : vector<16x32xf32>
    %19 = vector.multi_reduction <maximumf>, %18, %cst_12 [1] : vector<16x2x32xf32> to vector<16x32xf32>
    %c0_13 = arith.constant 0 : index
    %c0_14 = arith.constant 0 : index
    %20 = vector.load %arg5[%c0_13, %c0_14] : memref<32x128xf32, #tpu.memory_space<vmem>>, vector<32x128xf32>
    %cst_15 = arith.constant dense<0.000000e+00> : vector<16x128xf32>
    %21 = tpu.matmul %19, %20, %cst_15 {dimension_numbers = #tpu.dot_dimension_numbers<[1], [0], [0], [1], [0, 0, 1, 1], [], []>} : vector<16x32xf32>, vector<32x128xf32>, vector<16x128xf32> -> vector<16x128xf32>
    %c0_16 = arith.constant 0 : index
    %c0_17 = arith.constant 0 : index
    %22 = vector.load %arg7[%c0_16, %c0_17] : memref<1x128xf32, #tpu.memory_space<vmem>>, vector<1x128xf32>
    %23 = vector.broadcast %22 : vector<1x128xf32> to vector<16x128xf32>
    %24 = arith.addf %21, %23 : vector<16x128xf32>
    %25 = vector.shape_cast %24 : vector<16x128xf32> to vector<2x8x128xf32>
    %c0_18 = arith.constant 0 : index
    %c0_19 = arith.constant 0 : index
    %26 = vector.load %arg6[%c0_18, %c0_19] : memref<32x128xf32, #tpu.memory_space<vmem>>, vector<32x128xf32>
    %c0_20 = arith.constant 0 : index
    %c0_21 = arith.constant 0 : index
    %27 = vector.load %arg9[%c0_20, %c0_21] : memref<32x128xf32, #tpu.memory_space<vmem>>, vector<32x128xf32>
    %c0_22 = arith.constant 0 : index
    %c0_23 = arith.constant 0 : index
    %28 = vector.load %arg8[%c0_22, %c0_23] : memref<32x128xf32, #tpu.memory_space<vmem>>, vector<32x128xf32>
    %c0_24 = arith.constant 0 : index
    %c0_25 = arith.constant 0 : index
    %29 = vector.load %arg10[%c0_24, %c0_25] : memref<1x128xf32, #tpu.memory_space<vmem>>, vector<1x128xf32>
    %cst_26 = arith.constant 0.000000e+00 : f32
    %30 = vector.broadcast %cst_26 : f32 to vector<2x32xf32>
    %cst_27 = arith.constant 0.000000e+00 : f32
    %31 = vector.broadcast %cst_27 : f32 to vector<2x32xf32>
    %cst_28 = arith.constant 0.000000e+00 : f32
    %32 = vector.broadcast %cst_28 : f32 to vector<2x32xf32>
    %cst_29 = arith.constant 0.000000e+00 : f32
    %33 = vector.broadcast %cst_29 : f32 to vector<2x32xf32>
    %34 = vector.extract_strided_slice %25 {offsets = [0, 0, 0], sizes = [2, 1, 128], strides = [1, 1, 1]} : vector<2x8x128xf32> to vector<2x1x128xf32>
    %35 = vector.shape_cast %34 : vector<2x1x128xf32> to vector<2x128xf32>
    %cst_30 = arith.constant dense<0.000000e+00> : vector<2x128xf32>
    %36 = tpu.matmul %30, %26, %cst_30 {dimension_numbers = #tpu.dot_dimension_numbers<[1], [0], [0], [1], [0, 0, 1, 1], [], []>} : vector<2x32xf32>, vector<32x128xf32>, vector<2x128xf32> -> vector<2x128xf32>
    %37 = arith.addf %35, %36 : vector<2x128xf32>
    %38 = arith.negf %37 : vector<2x128xf32>
    %39 = math.exp %38 : vector<2x128xf32>
    %cst_31 = arith.constant 1.000000e+00 : f32
    %40 = vector.broadcast %cst_31 : f32 to vector<2x128xf32>
    %41 = arith.addf %40, %39 : vector<2x128xf32>
    %42 = arith.divf %40, %41 : vector<2x128xf32>
    %43 = vector.extract_strided_slice %42 {offsets = [0, 0], sizes = [2, 32], strides = [1, 1]} : vector<2x128xf32> to vector<2x32xf32>
    %44 = vector.extract_strided_slice %42 {offsets = [0, 32], sizes = [2, 32], strides = [1, 1]} : vector<2x128xf32> to vector<2x32xf32>
    %45 = vector.extract_strided_slice %42 {offsets = [0, 96], sizes = [2, 32], strides = [1, 1]} : vector<2x128xf32> to vector<2x32xf32>
    %46 = vector.extract_strided_slice %37 {offsets = [0, 64], sizes = [2, 32], strides = [1, 1]} : vector<2x128xf32> to vector<2x32xf32>
    %47 = math.tanh %46 : vector<2x32xf32>
    %48 = arith.mulf %44, %32 : vector<2x32xf32>
    %49 = arith.mulf %43, %47 : vector<2x32xf32>
    %50 = arith.addf %48, %49 : vector<2x32xf32>
    %51 = math.tanh %50 : vector<2x32xf32>
    %52 = arith.mulf %45, %51 : vector<2x32xf32>
    %cst_32 = arith.constant dense<0.000000e+00> : vector<2x128xf32>
    %53 = tpu.matmul %52, %28, %cst_32 {dimension_numbers = #tpu.dot_dimension_numbers<[1], [0], [0], [1], [0, 0, 1, 1], [], []>} : vector<2x32xf32>, vector<32x128xf32>, vector<2x128xf32> -> vector<2x128xf32>
    %54 = vector.broadcast %29 : vector<1x128xf32> to vector<2x128xf32>
    %55 = arith.addf %53, %54 : vector<2x128xf32>
    %cst_33 = arith.constant dense<0.000000e+00> : vector<2x128xf32>
    %56 = tpu.matmul %31, %27, %cst_33 {dimension_numbers = #tpu.dot_dimension_numbers<[1], [0], [0], [1], [0, 0, 1, 1], [], []>} : vector<2x32xf32>, vector<32x128xf32>, vector<2x128xf32> -> vector<2x128xf32>
    %57 = arith.addf %55, %56 : vector<2x128xf32>
    %58 = arith.negf %57 : vector<2x128xf32>
    %59 = math.exp %58 : vector<2x128xf32>
    %cst_34 = arith.constant 1.000000e+00 : f32
    %60 = vector.broadcast %cst_34 : f32 to vector<2x128xf32>
    %61 = arith.addf %60, %59 : vector<2x128xf32>
    %62 = arith.divf %60, %61 : vector<2x128xf32>
    %63 = vector.extract_strided_slice %62 {offsets = [0, 0], sizes = [2, 32], strides = [1, 1]} : vector<2x128xf32> to vector<2x32xf32>
    %64 = vector.extract_strided_slice %62 {offsets = [0, 32], sizes = [2, 32], strides = [1, 1]} : vector<2x128xf32> to vector<2x32xf32>
    %65 = vector.extract_strided_slice %62 {offsets = [0, 96], sizes = [2, 32], strides = [1, 1]} : vector<2x128xf32> to vector<2x32xf32>
    %66 = vector.extract_strided_slice %57 {offsets = [0, 64], sizes = [2, 32], strides = [1, 1]} : vector<2x128xf32> to vector<2x32xf32>
    %67 = math.tanh %66 : vector<2x32xf32>
    %68 = arith.mulf %64, %33 : vector<2x32xf32>
    %69 = arith.mulf %63, %67 : vector<2x32xf32>
    %70 = arith.addf %68, %69 : vector<2x32xf32>
    %71 = math.tanh %70 : vector<2x32xf32>
    %72 = arith.mulf %65, %71 : vector<2x32xf32>
    %73 = vector.extract_strided_slice %25 {offsets = [0, 1, 0], sizes = [2, 1, 128], strides = [1, 1, 1]} : vector<2x8x128xf32> to vector<2x1x128xf32>
    %74 = vector.shape_cast %73 : vector<2x1x128xf32> to vector<2x128xf32>
    %cst_35 = arith.constant dense<0.000000e+00> : vector<2x128xf32>
    %75 = tpu.matmul %52, %26, %cst_35 {dimension_numbers = #tpu.dot_dimension_numbers<[1], [0], [0], [1], [0, 0, 1, 1], [], []>} : vector<2x32xf32>, vector<32x128xf32>, vector<2x128xf32> -> vector<2x128xf32>
    %76 = arith.addf %74, %75 : vector<2x128xf32>
    %77 = arith.negf %76 : vector<2x128xf32>
    %78 = math.exp %77 : vector<2x128xf32>
    %cst_36 = arith.constant 1.000000e+00 : f32
    %79 = vector.broadcast %cst_36 : f32 to vector<2x128xf32>
    %80 = arith.addf %79, %78 : vector<2x128xf32>
    %81 = arith.divf %79, %80 : vector<2x128xf32>
    %82 = vector.extract_strided_slice %81 {offsets = [0, 0], sizes = [2, 32], strides = [1, 1]} : vector<2x128xf32> to vector<2x32xf32>
    %83 = vector.extract_strided_slice %81 {offsets = [0, 32], sizes = [2, 32], strides = [1, 1]} : vector<2x128xf32> to vector<2x32xf32>
    %84 = vector.extract_strided_slice %81 {offsets = [0, 96], sizes = [2, 32], strides = [1, 1]} : vector<2x128xf32> to vector<2x32xf32>
    %85 = vector.extract_strided_slice %76 {offsets = [0, 64], sizes = [2, 32], strides = [1, 1]} : vector<2x128xf32> to vector<2x32xf32>
    %86 = math.tanh %85 : vector<2x32xf32>
    %87 = arith.mulf %83, %50 : vector<2x32xf32>
    %88 = arith.mulf %82, %86 : vector<2x32xf32>
    %89 = arith.addf %87, %88 : vector<2x32xf32>
    %90 = math.tanh %89 : vector<2x32xf32>
    %91 = arith.mulf %84, %90 : vector<2x32xf32>
    %cst_37 = arith.constant dense<0.000000e+00> : vector<2x128xf32>
    %92 = tpu.matmul %91, %28, %cst_37 {dimension_numbers = #tpu.dot_dimension_numbers<[1], [0], [0], [1], [0, 0, 1, 1], [], []>} : vector<2x32xf32>, vector<32x128xf32>, vector<2x128xf32> -> vector<2x128xf32>
    %93 = vector.broadcast %29 : vector<1x128xf32> to vector<2x128xf32>
    %94 = arith.addf %92, %93 : vector<2x128xf32>
    %cst_38 = arith.constant dense<0.000000e+00> : vector<2x128xf32>
    %95 = tpu.matmul %72, %27, %cst_38 {dimension_numbers = #tpu.dot_dimension_numbers<[1], [0], [0], [1], [0, 0, 1, 1], [], []>} : vector<2x32xf32>, vector<32x128xf32>, vector<2x128xf32> -> vector<2x128xf32>
    %96 = arith.addf %94, %95 : vector<2x128xf32>
    %97 = arith.negf %96 : vector<2x128xf32>
    %98 = math.exp %97 : vector<2x128xf32>
    %cst_39 = arith.constant 1.000000e+00 : f32
    %99 = vector.broadcast %cst_39 : f32 to vector<2x128xf32>
    %100 = arith.addf %99, %98 : vector<2x128xf32>
    %101 = arith.divf %99, %100 : vector<2x128xf32>
    %102 = vector.extract_strided_slice %101 {offsets = [0, 0], sizes = [2, 32], strides = [1, 1]} : vector<2x128xf32> to vector<2x32xf32>
    %103 = vector.extract_strided_slice %101 {offsets = [0, 32], sizes = [2, 32], strides = [1, 1]} : vector<2x128xf32> to vector<2x32xf32>
    %104 = vector.extract_strided_slice %101 {offsets = [0, 96], sizes = [2, 32], strides = [1, 1]} : vector<2x128xf32> to vector<2x32xf32>
    %105 = vector.extract_strided_slice %96 {offsets = [0, 64], sizes = [2, 32], strides = [1, 1]} : vector<2x128xf32> to vector<2x32xf32>
    %106 = math.tanh %105 : vector<2x32xf32>
    %107 = arith.mulf %103, %70 : vector<2x32xf32>
    %108 = arith.mulf %102, %106 : vector<2x32xf32>
    %109 = arith.addf %107, %108 : vector<2x32xf32>
    %110 = math.tanh %109 : vector<2x32xf32>
    %111 = arith.mulf %104, %110 : vector<2x32xf32>
    %112 = vector.extract_strided_slice %25 {offsets = [0, 2, 0], sizes = [2, 1, 128], strides = [1, 1, 1]} : vector<2x8x128xf32> to vector<2x1x128xf32>
    %113 = vector.shape_cast %112 : vector<2x1x128xf32> to vector<2x128xf32>
    %cst_40 = arith.constant dense<0.000000e+00> : vector<2x128xf32>
    %114 = tpu.matmul %91, %26, %cst_40 {dimension_numbers = #tpu.dot_dimension_numbers<[1], [0], [0], [1], [0, 0, 1, 1], [], []>} : vector<2x32xf32>, vector<32x128xf32>, vector<2x128xf32> -> vector<2x128xf32>
    %115 = arith.addf %113, %114 : vector<2x128xf32>
    %116 = arith.negf %115 : vector<2x128xf32>
    %117 = math.exp %116 : vector<2x128xf32>
    %cst_41 = arith.constant 1.000000e+00 : f32
    %118 = vector.broadcast %cst_41 : f32 to vector<2x128xf32>
    %119 = arith.addf %118, %117 : vector<2x128xf32>
    %120 = arith.divf %118, %119 : vector<2x128xf32>
    %121 = vector.extract_strided_slice %120 {offsets = [0, 0], sizes = [2, 32], strides = [1, 1]} : vector<2x128xf32> to vector<2x32xf32>
    %122 = vector.extract_strided_slice %120 {offsets = [0, 32], sizes = [2, 32], strides = [1, 1]} : vector<2x128xf32> to vector<2x32xf32>
    %123 = vector.extract_strided_slice %120 {offsets = [0, 96], sizes = [2, 32], strides = [1, 1]} : vector<2x128xf32> to vector<2x32xf32>
    %124 = vector.extract_strided_slice %115 {offsets = [0, 64], sizes = [2, 32], strides = [1, 1]} : vector<2x128xf32> to vector<2x32xf32>
    %125 = math.tanh %124 : vector<2x32xf32>
    %126 = arith.mulf %122, %89 : vector<2x32xf32>
    %127 = arith.mulf %121, %125 : vector<2x32xf32>
    %128 = arith.addf %126, %127 : vector<2x32xf32>
    %129 = math.tanh %128 : vector<2x32xf32>
    %130 = arith.mulf %123, %129 : vector<2x32xf32>
    %cst_42 = arith.constant dense<0.000000e+00> : vector<2x128xf32>
    %131 = tpu.matmul %130, %28, %cst_42 {dimension_numbers = #tpu.dot_dimension_numbers<[1], [0], [0], [1], [0, 0, 1, 1], [], []>} : vector<2x32xf32>, vector<32x128xf32>, vector<2x128xf32> -> vector<2x128xf32>
    %132 = vector.broadcast %29 : vector<1x128xf32> to vector<2x128xf32>
    %133 = arith.addf %131, %132 : vector<2x128xf32>
    %cst_43 = arith.constant dense<0.000000e+00> : vector<2x128xf32>
    %134 = tpu.matmul %111, %27, %cst_43 {dimension_numbers = #tpu.dot_dimension_numbers<[1], [0], [0], [1], [0, 0, 1, 1], [], []>} : vector<2x32xf32>, vector<32x128xf32>, vector<2x128xf32> -> vector<2x128xf32>
    %135 = arith.addf %133, %134 : vector<2x128xf32>
    %136 = arith.negf %135 : vector<2x128xf32>
    %137 = math.exp %136 : vector<2x128xf32>
    %cst_44 = arith.constant 1.000000e+00 : f32
    %138 = vector.broadcast %cst_44 : f32 to vector<2x128xf32>
    %139 = arith.addf %138, %137 : vector<2x128xf32>
    %140 = arith.divf %138, %139 : vector<2x128xf32>
    %141 = vector.extract_strided_slice %140 {offsets = [0, 0], sizes = [2, 32], strides = [1, 1]} : vector<2x128xf32> to vector<2x32xf32>
    %142 = vector.extract_strided_slice %140 {offsets = [0, 32], sizes = [2, 32], strides = [1, 1]} : vector<2x128xf32> to vector<2x32xf32>
    %143 = vector.extract_strided_slice %140 {offsets = [0, 96], sizes = [2, 32], strides = [1, 1]} : vector<2x128xf32> to vector<2x32xf32>
    %144 = vector.extract_strided_slice %135 {offsets = [0, 64], sizes = [2, 32], strides = [1, 1]} : vector<2x128xf32> to vector<2x32xf32>
    %145 = math.tanh %144 : vector<2x32xf32>
    %146 = arith.mulf %142, %109 : vector<2x32xf32>
    %147 = arith.mulf %141, %145 : vector<2x32xf32>
    %148 = arith.addf %146, %147 : vector<2x32xf32>
    %149 = math.tanh %148 : vector<2x32xf32>
    %150 = arith.mulf %143, %149 : vector<2x32xf32>
    %151 = vector.extract_strided_slice %25 {offsets = [0, 3, 0], sizes = [2, 1, 128], strides = [1, 1, 1]} : vector<2x8x128xf32> to vector<2x1x128xf32>
    %152 = vector.shape_cast %151 : vector<2x1x128xf32> to vector<2x128xf32>
    %cst_45 = arith.constant dense<0.000000e+00> : vector<2x128xf32>
    %153 = tpu.matmul %130, %26, %cst_45 {dimension_numbers = #tpu.dot_dimension_numbers<[1], [0], [0], [1], [0, 0, 1, 1], [], []>} : vector<2x32xf32>, vector<32x128xf32>, vector<2x128xf32> -> vector<2x128xf32>
    %154 = arith.addf %152, %153 : vector<2x128xf32>
    %155 = arith.negf %154 : vector<2x128xf32>
    %156 = math.exp %155 : vector<2x128xf32>
    %cst_46 = arith.constant 1.000000e+00 : f32
    %157 = vector.broadcast %cst_46 : f32 to vector<2x128xf32>
    %158 = arith.addf %157, %156 : vector<2x128xf32>
    %159 = arith.divf %157, %158 : vector<2x128xf32>
    %160 = vector.extract_strided_slice %159 {offsets = [0, 0], sizes = [2, 32], strides = [1, 1]} : vector<2x128xf32> to vector<2x32xf32>
    %161 = vector.extract_strided_slice %159 {offsets = [0, 32], sizes = [2, 32], strides = [1, 1]} : vector<2x128xf32> to vector<2x32xf32>
    %162 = vector.extract_strided_slice %159 {offsets = [0, 96], sizes = [2, 32], strides = [1, 1]} : vector<2x128xf32> to vector<2x32xf32>
    %163 = vector.extract_strided_slice %154 {offsets = [0, 64], sizes = [2, 32], strides = [1, 1]} : vector<2x128xf32> to vector<2x32xf32>
    %164 = math.tanh %163 : vector<2x32xf32>
    %165 = arith.mulf %161, %128 : vector<2x32xf32>
    %166 = arith.mulf %160, %164 : vector<2x32xf32>
    %167 = arith.addf %165, %166 : vector<2x32xf32>
    %168 = math.tanh %167 : vector<2x32xf32>
    %169 = arith.mulf %162, %168 : vector<2x32xf32>
    %cst_47 = arith.constant dense<0.000000e+00> : vector<2x128xf32>
    %170 = tpu.matmul %169, %28, %cst_47 {dimension_numbers = #tpu.dot_dimension_numbers<[1], [0], [0], [1], [0, 0, 1, 1], [], []>} : vector<2x32xf32>, vector<32x128xf32>, vector<2x128xf32> -> vector<2x128xf32>
    %171 = vector.broadcast %29 : vector<1x128xf32> to vector<2x128xf32>
    %172 = arith.addf %170, %171 : vector<2x128xf32>
    %cst_48 = arith.constant dense<0.000000e+00> : vector<2x128xf32>
    %173 = tpu.matmul %150, %27, %cst_48 {dimension_numbers = #tpu.dot_dimension_numbers<[1], [0], [0], [1], [0, 0, 1, 1], [], []>} : vector<2x32xf32>, vector<32x128xf32>, vector<2x128xf32> -> vector<2x128xf32>
    %174 = arith.addf %172, %173 : vector<2x128xf32>
    %175 = arith.negf %174 : vector<2x128xf32>
    %176 = math.exp %175 : vector<2x128xf32>
    %cst_49 = arith.constant 1.000000e+00 : f32
    %177 = vector.broadcast %cst_49 : f32 to vector<2x128xf32>
    %178 = arith.addf %177, %176 : vector<2x128xf32>
    %179 = arith.divf %177, %178 : vector<2x128xf32>
    %180 = vector.extract_strided_slice %179 {offsets = [0, 0], sizes = [2, 32], strides = [1, 1]} : vector<2x128xf32> to vector<2x32xf32>
    %181 = vector.extract_strided_slice %179 {offsets = [0, 32], sizes = [2, 32], strides = [1, 1]} : vector<2x128xf32> to vector<2x32xf32>
    %182 = vector.extract_strided_slice %179 {offsets = [0, 96], sizes = [2, 32], strides = [1, 1]} : vector<2x128xf32> to vector<2x32xf32>
    %183 = vector.extract_strided_slice %174 {offsets = [0, 64], sizes = [2, 32], strides = [1, 1]} : vector<2x128xf32> to vector<2x32xf32>
    %184 = math.tanh %183 : vector<2x32xf32>
    %185 = arith.mulf %181, %148 : vector<2x32xf32>
    %186 = arith.mulf %180, %184 : vector<2x32xf32>
    %187 = arith.addf %185, %186 : vector<2x32xf32>
    %188 = math.tanh %187 : vector<2x32xf32>
    %189 = arith.mulf %182, %188 : vector<2x32xf32>
    %190 = vector.extract_strided_slice %25 {offsets = [0, 4, 0], sizes = [2, 1, 128], strides = [1, 1, 1]} : vector<2x8x128xf32> to vector<2x1x128xf32>
    %191 = vector.shape_cast %190 : vector<2x1x128xf32> to vector<2x128xf32>
    %cst_50 = arith.constant dense<0.000000e+00> : vector<2x128xf32>
    %192 = tpu.matmul %169, %26, %cst_50 {dimension_numbers = #tpu.dot_dimension_numbers<[1], [0], [0], [1], [0, 0, 1, 1], [], []>} : vector<2x32xf32>, vector<32x128xf32>, vector<2x128xf32> -> vector<2x128xf32>
    %193 = arith.addf %191, %192 : vector<2x128xf32>
    %194 = arith.negf %193 : vector<2x128xf32>
    %195 = math.exp %194 : vector<2x128xf32>
    %cst_51 = arith.constant 1.000000e+00 : f32
    %196 = vector.broadcast %cst_51 : f32 to vector<2x128xf32>
    %197 = arith.addf %196, %195 : vector<2x128xf32>
    %198 = arith.divf %196, %197 : vector<2x128xf32>
    %199 = vector.extract_strided_slice %198 {offsets = [0, 0], sizes = [2, 32], strides = [1, 1]} : vector<2x128xf32> to vector<2x32xf32>
    %200 = vector.extract_strided_slice %198 {offsets = [0, 32], sizes = [2, 32], strides = [1, 1]} : vector<2x128xf32> to vector<2x32xf32>
    %201 = vector.extract_strided_slice %198 {offsets = [0, 96], sizes = [2, 32], strides = [1, 1]} : vector<2x128xf32> to vector<2x32xf32>
    %202 = vector.extract_strided_slice %193 {offsets = [0, 64], sizes = [2, 32], strides = [1, 1]} : vector<2x128xf32> to vector<2x32xf32>
    %203 = math.tanh %202 : vector<2x32xf32>
    %204 = arith.mulf %200, %167 : vector<2x32xf32>
    %205 = arith.mulf %199, %203 : vector<2x32xf32>
    %206 = arith.addf %204, %205 : vector<2x32xf32>
    %207 = math.tanh %206 : vector<2x32xf32>
    %208 = arith.mulf %201, %207 : vector<2x32xf32>
    %cst_52 = arith.constant dense<0.000000e+00> : vector<2x128xf32>
    %209 = tpu.matmul %208, %28, %cst_52 {dimension_numbers = #tpu.dot_dimension_numbers<[1], [0], [0], [1], [0, 0, 1, 1], [], []>} : vector<2x32xf32>, vector<32x128xf32>, vector<2x128xf32> -> vector<2x128xf32>
    %210 = vector.broadcast %29 : vector<1x128xf32> to vector<2x128xf32>
    %211 = arith.addf %209, %210 : vector<2x128xf32>
    %cst_53 = arith.constant dense<0.000000e+00> : vector<2x128xf32>
    %212 = tpu.matmul %189, %27, %cst_53 {dimension_numbers = #tpu.dot_dimension_numbers<[1], [0], [0], [1], [0, 0, 1, 1], [], []>} : vector<2x32xf32>, vector<32x128xf32>, vector<2x128xf32> -> vector<2x128xf32>
    %213 = arith.addf %211, %212 : vector<2x128xf32>
    %214 = arith.negf %213 : vector<2x128xf32>
    %215 = math.exp %214 : vector<2x128xf32>
    %cst_54 = arith.constant 1.000000e+00 : f32
    %216 = vector.broadcast %cst_54 : f32 to vector<2x128xf32>
    %217 = arith.addf %216, %215 : vector<2x128xf32>
    %218 = arith.divf %216, %217 : vector<2x128xf32>
    %219 = vector.extract_strided_slice %218 {offsets = [0, 0], sizes = [2, 32], strides = [1, 1]} : vector<2x128xf32> to vector<2x32xf32>
    %220 = vector.extract_strided_slice %218 {offsets = [0, 32], sizes = [2, 32], strides = [1, 1]} : vector<2x128xf32> to vector<2x32xf32>
    %221 = vector.extract_strided_slice %218 {offsets = [0, 96], sizes = [2, 32], strides = [1, 1]} : vector<2x128xf32> to vector<2x32xf32>
    %222 = vector.extract_strided_slice %213 {offsets = [0, 64], sizes = [2, 32], strides = [1, 1]} : vector<2x128xf32> to vector<2x32xf32>
    %223 = math.tanh %222 : vector<2x32xf32>
    %224 = arith.mulf %220, %187 : vector<2x32xf32>
    %225 = arith.mulf %219, %223 : vector<2x32xf32>
    %226 = arith.addf %224, %225 : vector<2x32xf32>
    %227 = math.tanh %226 : vector<2x32xf32>
    %228 = arith.mulf %221, %227 : vector<2x32xf32>
    %229 = vector.extract_strided_slice %25 {offsets = [0, 5, 0], sizes = [2, 1, 128], strides = [1, 1, 1]} : vector<2x8x128xf32> to vector<2x1x128xf32>
    %230 = vector.shape_cast %229 : vector<2x1x128xf32> to vector<2x128xf32>
    %cst_55 = arith.constant dense<0.000000e+00> : vector<2x128xf32>
    %231 = tpu.matmul %208, %26, %cst_55 {dimension_numbers = #tpu.dot_dimension_numbers<[1], [0], [0], [1], [0, 0, 1, 1], [], []>} : vector<2x32xf32>, vector<32x128xf32>, vector<2x128xf32> -> vector<2x128xf32>
    %232 = arith.addf %230, %231 : vector<2x128xf32>
    %233 = arith.negf %232 : vector<2x128xf32>
    %234 = math.exp %233 : vector<2x128xf32>
    %cst_56 = arith.constant 1.000000e+00 : f32
    %235 = vector.broadcast %cst_56 : f32 to vector<2x128xf32>
    %236 = arith.addf %235, %234 : vector<2x128xf32>
    %237 = arith.divf %235, %236 : vector<2x128xf32>
    %238 = vector.extract_strided_slice %237 {offsets = [0, 0], sizes = [2, 32], strides = [1, 1]} : vector<2x128xf32> to vector<2x32xf32>
    %239 = vector.extract_strided_slice %237 {offsets = [0, 32], sizes = [2, 32], strides = [1, 1]} : vector<2x128xf32> to vector<2x32xf32>
    %240 = vector.extract_strided_slice %237 {offsets = [0, 96], sizes = [2, 32], strides = [1, 1]} : vector<2x128xf32> to vector<2x32xf32>
    %241 = vector.extract_strided_slice %232 {offsets = [0, 64], sizes = [2, 32], strides = [1, 1]} : vector<2x128xf32> to vector<2x32xf32>
    %242 = math.tanh %241 : vector<2x32xf32>
    %243 = arith.mulf %239, %206 : vector<2x32xf32>
    %244 = arith.mulf %238, %242 : vector<2x32xf32>
    %245 = arith.addf %243, %244 : vector<2x32xf32>
    %246 = math.tanh %245 : vector<2x32xf32>
    %247 = arith.mulf %240, %246 : vector<2x32xf32>
    %cst_57 = arith.constant dense<0.000000e+00> : vector<2x128xf32>
    %248 = tpu.matmul %247, %28, %cst_57 {dimension_numbers = #tpu.dot_dimension_numbers<[1], [0], [0], [1], [0, 0, 1, 1], [], []>} : vector<2x32xf32>, vector<32x128xf32>, vector<2x128xf32> -> vector<2x128xf32>
    %249 = vector.broadcast %29 : vector<1x128xf32> to vector<2x128xf32>
    %250 = arith.addf %248, %249 : vector<2x128xf32>
    %cst_58 = arith.constant dense<0.000000e+00> : vector<2x128xf32>
    %251 = tpu.matmul %228, %27, %cst_58 {dimension_numbers = #tpu.dot_dimension_numbers<[1], [0], [0], [1], [0, 0, 1, 1], [], []>} : vector<2x32xf32>, vector<32x128xf32>, vector<2x128xf32> -> vector<2x128xf32>
    %252 = arith.addf %250, %251 : vector<2x128xf32>
    %253 = arith.negf %252 : vector<2x128xf32>
    %254 = math.exp %253 : vector<2x128xf32>
    %cst_59 = arith.constant 1.000000e+00 : f32
    %255 = vector.broadcast %cst_59 : f32 to vector<2x128xf32>
    %256 = arith.addf %255, %254 : vector<2x128xf32>
    %257 = arith.divf %255, %256 : vector<2x128xf32>
    %258 = vector.extract_strided_slice %257 {offsets = [0, 0], sizes = [2, 32], strides = [1, 1]} : vector<2x128xf32> to vector<2x32xf32>
    %259 = vector.extract_strided_slice %257 {offsets = [0, 32], sizes = [2, 32], strides = [1, 1]} : vector<2x128xf32> to vector<2x32xf32>
    %260 = vector.extract_strided_slice %257 {offsets = [0, 96], sizes = [2, 32], strides = [1, 1]} : vector<2x128xf32> to vector<2x32xf32>
    %261 = vector.extract_strided_slice %252 {offsets = [0, 64], sizes = [2, 32], strides = [1, 1]} : vector<2x128xf32> to vector<2x32xf32>
    %262 = math.tanh %261 : vector<2x32xf32>
    %263 = arith.mulf %259, %226 : vector<2x32xf32>
    %264 = arith.mulf %258, %262 : vector<2x32xf32>
    %265 = arith.addf %263, %264 : vector<2x32xf32>
    %266 = math.tanh %265 : vector<2x32xf32>
    %267 = arith.mulf %260, %266 : vector<2x32xf32>
    %268 = vector.extract_strided_slice %25 {offsets = [0, 6, 0], sizes = [2, 1, 128], strides = [1, 1, 1]} : vector<2x8x128xf32> to vector<2x1x128xf32>
    %269 = vector.shape_cast %268 : vector<2x1x128xf32> to vector<2x128xf32>
    %cst_60 = arith.constant dense<0.000000e+00> : vector<2x128xf32>
    %270 = tpu.matmul %247, %26, %cst_60 {dimension_numbers = #tpu.dot_dimension_numbers<[1], [0], [0], [1], [0, 0, 1, 1], [], []>} : vector<2x32xf32>, vector<32x128xf32>, vector<2x128xf32> -> vector<2x128xf32>
    %271 = arith.addf %269, %270 : vector<2x128xf32>
    %272 = arith.negf %271 : vector<2x128xf32>
    %273 = math.exp %272 : vector<2x128xf32>
    %cst_61 = arith.constant 1.000000e+00 : f32
    %274 = vector.broadcast %cst_61 : f32 to vector<2x128xf32>
    %275 = arith.addf %274, %273 : vector<2x128xf32>
    %276 = arith.divf %274, %275 : vector<2x128xf32>
    %277 = vector.extract_strided_slice %276 {offsets = [0, 0], sizes = [2, 32], strides = [1, 1]} : vector<2x128xf32> to vector<2x32xf32>
    %278 = vector.extract_strided_slice %276 {offsets = [0, 32], sizes = [2, 32], strides = [1, 1]} : vector<2x128xf32> to vector<2x32xf32>
    %279 = vector.extract_strided_slice %276 {offsets = [0, 96], sizes = [2, 32], strides = [1, 1]} : vector<2x128xf32> to vector<2x32xf32>
    %280 = vector.extract_strided_slice %271 {offsets = [0, 64], sizes = [2, 32], strides = [1, 1]} : vector<2x128xf32> to vector<2x32xf32>
    %281 = math.tanh %280 : vector<2x32xf32>
    %282 = arith.mulf %278, %245 : vector<2x32xf32>
    %283 = arith.mulf %277, %281 : vector<2x32xf32>
    %284 = arith.addf %282, %283 : vector<2x32xf32>
    %285 = math.tanh %284 : vector<2x32xf32>
    %286 = arith.mulf %279, %285 : vector<2x32xf32>
    %cst_62 = arith.constant dense<0.000000e+00> : vector<2x128xf32>
    %287 = tpu.matmul %286, %28, %cst_62 {dimension_numbers = #tpu.dot_dimension_numbers<[1], [0], [0], [1], [0, 0, 1, 1], [], []>} : vector<2x32xf32>, vector<32x128xf32>, vector<2x128xf32> -> vector<2x128xf32>
    %288 = vector.broadcast %29 : vector<1x128xf32> to vector<2x128xf32>
    %289 = arith.addf %287, %288 : vector<2x128xf32>
    %cst_63 = arith.constant dense<0.000000e+00> : vector<2x128xf32>
    %290 = tpu.matmul %267, %27, %cst_63 {dimension_numbers = #tpu.dot_dimension_numbers<[1], [0], [0], [1], [0, 0, 1, 1], [], []>} : vector<2x32xf32>, vector<32x128xf32>, vector<2x128xf32> -> vector<2x128xf32>
    %291 = arith.addf %289, %290 : vector<2x128xf32>
    %292 = arith.negf %291 : vector<2x128xf32>
    %293 = math.exp %292 : vector<2x128xf32>
    %cst_64 = arith.constant 1.000000e+00 : f32
    %294 = vector.broadcast %cst_64 : f32 to vector<2x128xf32>
    %295 = arith.addf %294, %293 : vector<2x128xf32>
    %296 = arith.divf %294, %295 : vector<2x128xf32>
    %297 = vector.extract_strided_slice %296 {offsets = [0, 0], sizes = [2, 32], strides = [1, 1]} : vector<2x128xf32> to vector<2x32xf32>
    %298 = vector.extract_strided_slice %296 {offsets = [0, 32], sizes = [2, 32], strides = [1, 1]} : vector<2x128xf32> to vector<2x32xf32>
    %299 = vector.extract_strided_slice %296 {offsets = [0, 96], sizes = [2, 32], strides = [1, 1]} : vector<2x128xf32> to vector<2x32xf32>
    %300 = vector.extract_strided_slice %291 {offsets = [0, 64], sizes = [2, 32], strides = [1, 1]} : vector<2x128xf32> to vector<2x32xf32>
    %301 = math.tanh %300 : vector<2x32xf32>
    %302 = arith.mulf %298, %265 : vector<2x32xf32>
    %303 = arith.mulf %297, %301 : vector<2x32xf32>
    %304 = arith.addf %302, %303 : vector<2x32xf32>
    %305 = math.tanh %304 : vector<2x32xf32>
    %306 = arith.mulf %299, %305 : vector<2x32xf32>
    %307 = vector.extract_strided_slice %25 {offsets = [0, 7, 0], sizes = [2, 1, 128], strides = [1, 1, 1]} : vector<2x8x128xf32> to vector<2x1x128xf32>
    %308 = vector.shape_cast %307 : vector<2x1x128xf32> to vector<2x128xf32>
    %cst_65 = arith.constant dense<0.000000e+00> : vector<2x128xf32>
    %309 = tpu.matmul %286, %26, %cst_65 {dimension_numbers = #tpu.dot_dimension_numbers<[1], [0], [0], [1], [0, 0, 1, 1], [], []>} : vector<2x32xf32>, vector<32x128xf32>, vector<2x128xf32> -> vector<2x128xf32>
    %310 = arith.addf %308, %309 : vector<2x128xf32>
    %311 = arith.negf %310 : vector<2x128xf32>
    %312 = math.exp %311 : vector<2x128xf32>
    %cst_66 = arith.constant 1.000000e+00 : f32
    %313 = vector.broadcast %cst_66 : f32 to vector<2x128xf32>
    %314 = arith.addf %313, %312 : vector<2x128xf32>
    %315 = arith.divf %313, %314 : vector<2x128xf32>
    %316 = vector.extract_strided_slice %315 {offsets = [0, 0], sizes = [2, 32], strides = [1, 1]} : vector<2x128xf32> to vector<2x32xf32>
    %317 = vector.extract_strided_slice %315 {offsets = [0, 32], sizes = [2, 32], strides = [1, 1]} : vector<2x128xf32> to vector<2x32xf32>
    %318 = vector.extract_strided_slice %315 {offsets = [0, 96], sizes = [2, 32], strides = [1, 1]} : vector<2x128xf32> to vector<2x32xf32>
    %319 = vector.extract_strided_slice %310 {offsets = [0, 64], sizes = [2, 32], strides = [1, 1]} : vector<2x128xf32> to vector<2x32xf32>
    %320 = math.tanh %319 : vector<2x32xf32>
    %321 = arith.mulf %317, %284 : vector<2x32xf32>
    %322 = arith.mulf %316, %320 : vector<2x32xf32>
    %323 = arith.addf %321, %322 : vector<2x32xf32>
    %324 = math.tanh %323 : vector<2x32xf32>
    %325 = arith.mulf %318, %324 : vector<2x32xf32>
    %cst_67 = arith.constant dense<0.000000e+00> : vector<2x128xf32>
    %326 = tpu.matmul %325, %28, %cst_67 {dimension_numbers = #tpu.dot_dimension_numbers<[1], [0], [0], [1], [0, 0, 1, 1], [], []>} : vector<2x32xf32>, vector<32x128xf32>, vector<2x128xf32> -> vector<2x128xf32>
    %327 = vector.broadcast %29 : vector<1x128xf32> to vector<2x128xf32>
    %328 = arith.addf %326, %327 : vector<2x128xf32>
    %cst_68 = arith.constant dense<0.000000e+00> : vector<2x128xf32>
    %329 = tpu.matmul %306, %27, %cst_68 {dimension_numbers = #tpu.dot_dimension_numbers<[1], [0], [0], [1], [0, 0, 1, 1], [], []>} : vector<2x32xf32>, vector<32x128xf32>, vector<2x128xf32> -> vector<2x128xf32>
    %330 = arith.addf %328, %329 : vector<2x128xf32>
    %331 = arith.negf %330 : vector<2x128xf32>
    %332 = math.exp %331 : vector<2x128xf32>
    %cst_69 = arith.constant 1.000000e+00 : f32
    %333 = vector.broadcast %cst_69 : f32 to vector<2x128xf32>
    %334 = arith.addf %333, %332 : vector<2x128xf32>
    %335 = arith.divf %333, %334 : vector<2x128xf32>
    %336 = vector.extract_strided_slice %335 {offsets = [0, 0], sizes = [2, 32], strides = [1, 1]} : vector<2x128xf32> to vector<2x32xf32>
    %337 = vector.extract_strided_slice %335 {offsets = [0, 32], sizes = [2, 32], strides = [1, 1]} : vector<2x128xf32> to vector<2x32xf32>
    %338 = vector.extract_strided_slice %335 {offsets = [0, 96], sizes = [2, 32], strides = [1, 1]} : vector<2x128xf32> to vector<2x32xf32>
    %339 = vector.extract_strided_slice %330 {offsets = [0, 64], sizes = [2, 32], strides = [1, 1]} : vector<2x128xf32> to vector<2x32xf32>
    %340 = math.tanh %339 : vector<2x32xf32>
    %341 = arith.mulf %337, %304 : vector<2x32xf32>
    %342 = arith.mulf %336, %340 : vector<2x32xf32>
    %343 = arith.addf %341, %342 : vector<2x32xf32>
    %344 = math.tanh %343 : vector<2x32xf32>
    %345 = arith.mulf %338, %344 : vector<2x32xf32>
    %c0_70 = arith.constant 0 : index
    %c0_71 = arith.constant 0 : index
    %346 = vector.load %arg11[%c0_70, %c0_71] : memref<32x8xf32, #tpu.memory_space<vmem>>, vector<32x8xf32>
    %cst_72 = arith.constant dense<0.000000e+00> : vector<2x8xf32>
    %347 = tpu.matmul %345, %346, %cst_72 {dimension_numbers = #tpu.dot_dimension_numbers<[1], [0], [0], [1], [0, 0, 1, 1], [], []>} : vector<2x32xf32>, vector<32x8xf32>, vector<2x8xf32> -> vector<2x8xf32>
    %c0_73 = arith.constant 0 : index
    %c0_74 = arith.constant 0 : index
    %348 = vector.load %arg12[%c0_73, %c0_74] : memref<1x8xf32, #tpu.memory_space<vmem>>, vector<1x8xf32>
    %349 = vector.broadcast %348 : vector<1x8xf32> to vector<2x8xf32>
    %350 = arith.addf %347, %349 : vector<2x8xf32>
    %c0_75 = arith.constant 0 : index
    %c0_76 = arith.constant 0 : index
    %351 = vector.load %arg13[%c0_75, %c0_76] : memref<2x8xf32, #tpu.memory_space<vmem>>, vector<2x8xf32>
    tpu.vector_store %arg13[%c0_75, %c0_76], %350 {strides = array<i32>} : memref<2x8xf32, #tpu.memory_space<vmem>>, vector<2x8xf32>,
    return
  }
}

</mosaic_0001>

<bundles_post_ra>
// kernel: tpu_custom_call.1
= control target key start
LH: loop header
LB: loop body
LE: loop exit
PB: predicated region body
PF: predicated region fallthrough
CT: control target
= control target key end

     0   :  { %18 = vsyncpa [#allocation3], 0  ;;  %s3069_s0 = inlined_call_operand.vmem [shape: f32[2,18,4], index: 0, kind: input, shape index: {}]   ;;  %s3070_s1 = inlined_call_operand.vmem [shape: f32[4,32], index: 1, kind: input, shape index: {}]   ;;  %s3071_s2 = inlined_call_operand.vmem [shape: f32[4,32], index: 2, kind: input, shape index: {}]   ;;  %s3072_s3 = inlined_call_operand.vmem [shape: f32[4,32], index: 3, kind: input, shape index: {}]   ;;  %s3073_s4 = inlined_call_operand.vmem [shape: f32[1,32], index: 4, kind: input, shape index: {}]   ;;  %s3074_s5 = inlined_call_operand.vmem [shape: f32[32,128], index: 5, kind: input, shape index: {}]   ;;  %s3075_s6 = inlined_call_operand.vmem [shape: f32[32,128], index: 6, kind: input, shape index: {}]   ;;  %s3076_s7 = inlined_call_operand.vmem [shape: f32[1,128], index: 7, kind: input, shape index: {}]   ;;  %s3077_s8 = inlined_call_operand.hbm [shape: f32[32,128], index: 8, kind: input, shape index: {}]   ;;  %s3078_s9 = inlined_call_operand.hbm [shape: f32[32,128], index: 9, kind: input, shape index: {}]   ;;  %s3079_s10 = inlined_call_operand.vmem [shape: f32[1,128], index: 10, kind: input, shape index: {}]   ;;  %s3080_s11 = inlined_call_operand.vmem [shape: f32[32,8], index: 11, kind: input, shape index: {}]   ;;  %s3081_s12 = inlined_call_operand.vmem [shape: f32[1,8], index: 12, kind: input, shape index: {}]   ;;  %s3082_s13 = inlined_call_operand.hbm [shape: f32[2,8], index: 13, kind: output, shape index: {}]  }
   0x1   :  { %19 = vsyncpa [#allocation6], 0 }
   0x2   :  { %20 = vsyncpa [#allocation4], 0  ;;  %s41_s27 = sshll.u32 %s3077_s8, 4  ;;  %s2470_s28 = smov [#allocation2]   ;;  %s42_s27 = int_to_ptr.hbm [resolvable:$true] %s41_s27 }
   0x3   :  { %s43_s29 = sshll.u32 %s2470_s28, 4  ;;  %s54_s15 = sshll.u32 %s3078_s9, 4  ;;  %s44_s29 = int_to_ptr.vmem [resolvable:$true] %s43_s29  ;;  %s55_s15 = int_to_ptr.hbm [resolvable:$true] %s54_s15 }
   0x4   :  { %s2471_s16 = smov 128   ;;  %s2472_s17 = smov 8  }
   0x5   :  { %49 = dma.hbm_to_vmem [thread:$0]  %s42_s27, 512, %s44_s29, [#allocation3], %s2471_s16, %s2471_s16, %s2472_s17  }
   0x6   :  { %s2473_s18 = smov [#allocation5]  }
   0x7   :  { %s56_s19 = sshll.u32 %s2473_s18, 4  ;;  %s57_s19 = int_to_ptr.vmem [resolvable:$true] %s56_s19 }
   0x8   :  { %62 = dma.hbm_to_vmem [thread:$0]  %s55_s15, 512, %s57_s19, [#allocation6], %s2471_s16, %s2471_s16, %s2472_s17  }
   0x9   :  { %2464 = dma.done.wait [#allocation3], 512  }
   0xa   :  { %2465 = vsyncadd [#allocation3], 4294966784 }
   0xb   :  { %2466 = dma.done.wait [#allocation6], 512  }
   0xc   :  { %2467 = vsyncadd [#allocation6], 4294966784  ;;  %vm122_vm0 = vcmask 1043456   ;;  %vm100_vm1 = vcmask 1045504   ;;  %v195_v0 = vld [vmem:[%s3072_s3] sm:$0xf] }
   0xd   :  { %v77_v1 = vld [vmem:[%s3069_s0] sm:$0xff]  ;;  %v78_v2 = vld [vmem:[%s3069_s0 + $0x8] sm:$0xff]  ;;  %vm113_vm2 = vcmask 31744   ;;  %vm89_vm3 = vcmask 1046528   ;;  %2121 = vmatpush.msk.msra.mxu2 %vm122_vm0, %v195_v0  ;;  %v79_v9 = vld [vmem:[%s3069_s0 + $0x10] sm:$0x3] }
   0xe   :  { %v101_v3 = vrot.slane %v77_v1, 2  ;;  %v102_v4 = vrot.slane %v78_v2, 2  ;;  %v112_v5 = vld [vmem:[%s3071_s2] sm:$0xf]  ;;  %v90_v7 = vrot.slane %v77_v1, 1  ;;  %v91_v8 = vrot.slane %v78_v2, 1 }
   0xf   :  { %v111_v6 = vld [vmem:[%s3070_s1] sm:$0xf]  ;;  %2111 = vmatpush.msk.msra.mxu0 %vm122_vm0, %v112_v5  ;;  %v104_v12 = vrot.slane %v79_v9, 2  ;;  %v93_v13 = vrot.slane %v79_v9, 1  ;;  %v80_v16 = vld [vmem:[%s3069_s0 + $0x18] sm:$0xff]  ;;  %v391_v31 = vld [vmem:[%s3074_s5 + $0x10] sm:$0xff] }
  0x10   :  { %2116 = vmatpush.msk.msra.mxu1 %vm122_vm0, %v111_v6  ;;  %v103_v10 = vsel %vm100_vm1, %v101_v3, %v102_v4  ;;  %v92_v11 = vsel %vm89_vm3, %v90_v7, %v91_v8  ;;  %v81_v17 = vld [vmem:[%s3069_s0 + $0x20] sm:$0xff]  ;;  %v106_v18 = vrot.slane %v80_v16, 2  ;;  %v95_v20 = vrot.slane %v80_v16, 1  ;;  %v82_v24 = vld [vmem:[%s3069_s0 + $0x28] sm:$0x3]  ;;  %v392_v29 = vld [vmem:[%s3074_s5 + $0x18] sm:$0xff] }
  0x11   :  { %2117 = vmatmul.msk.f32.vlgmr.msra.gmra.mxu1 %vm113_vm2, %v77_v1  ;;  %2122 = vmatmul.msk.f32.vlgmr.msra.gmra.mxu2 %vm113_vm2, %v103_v10  ;;  %v105_v14 = vsel %vm100_vm1, %v102_v4, %v104_v12  ;;  %v94_v15 = vsel %vm89_vm3, %v91_v8, %v93_v13  ;;  %v107_v19 = vrot.slane %v81_v17, 2  ;;  %v96_v21 = vrot.slane %v81_v17, 1  ;;  %v390_v33 = vld [vmem:[%s3074_s5 + $0x8] sm:$0xff]  ;;  %v389_v35 = vld [vmem:[%s3074_s5] sm:$0xff]  ;;  %v2626_v56 = vld [vmem:[%s3075_s6 + $0x18] sm:$0xff]  ;;  %s2475_s2 = smov 64  }
  0x12   :  { %2112 = vmatmul.msk.f32.vlgmr.msra.gmra.mxu0 %vm113_vm2, %v92_v11  ;;  %v109_v25 = vrot.slane %v82_v24, 2  ;;  %v98_v26 = vrot.slane %v82_v24, 1  ;;  %451 = vmatpush.msra.mxu3 %v392_v29  ;;  %v2616_v36 = vld [vmem:[%s3073_s4] ss:$0 sm:$0xff]  ;;  %vm276_vm4 = vcmask 254976   ;;  %v2631_v57 = vld [vmem:[%s3075_s6 + $0x10] sm:$0xff] }
  0x13   :  { %v108_v22 = vsel %vm100_vm1, %v106_v18, %v107_v19  ;;  %v97_v23 = vsel %vm89_vm3, %v95_v20, %v96_v21  ;;  %679 = vmatpush.msrb.mxu1 %v2626_v56  ;;  %vm413_vm5 = vcmask 1041409   ;;  %vm415_vm6 = vcmask 1042434   ;;  %s2477_s27 = smov [#allocation7]  }
  0x14   :  { %v110_v27 = vsel %vm100_vm1, %v107_v19, %v109_v25  ;;  %v99_v28 = vsel %vm89_vm3, %v96_v21, %v98_v26  ;;  %452 = vmatpush.msra.mxu3 %v391_v31  ;;  %vm417_vm7 = vcmask 1043459   ;;  %vm419_vm8 = vcmask 1044484   ;;  %s2098_s3 = sshll.u32 %s2477_s27, 4  ;;  %s2099_s3 = int_to_ptr.vmem [resolvable:$true] %s2098_s3 }
  0x15   :  { %680 = vmatpush.msrb.mxu1 %v2631_v57  ;;  %vm421_vm9 = vcmask 1045509   ;;  %vm423_vm10 = vcmask 1046534   ;;  %vm425_vm11 = vcmask 1047559   ;;  %vm434_vm12 = vcmask 261120  }
  0x16   :  { %453 = vmatpush.msra.mxu3 %v390_v33 }
  0x18   :  { %454 = vmatpush.msra.mxu3 %v389_v35 }
  0x19   :  { %2118 = vmatmul.msk.f32.gmra.mxu1 %vm113_vm2, %v78_v2  ;;  %2123 = vmatmul.msk.f32.gmra.mxu2 %vm113_vm2, %v105_v14 }
  0x1a   :  { %2113 = vmatmul.msk.f32.gmra.mxu0 %vm113_vm2, %v94_v15  ;;  %490 = vmatpush.msrb.mxu3 %v2626_v56 }
  0x1c   :  { %491 = vmatpush.msrb.mxu3 %v2631_v57 }
  0x21   :  { %2119 = vmatmul.msk.f32.gmra.mxu1 %vm113_vm2, %v80_v16  ;;  %2124 = vmatmul.msk.f32.gmra.mxu2 %vm113_vm2, %v108_v22 }
  0x22   :  { %2114 = vmatmul.msk.f32.gmra.mxu0 %vm113_vm2, %v97_v23 }
  0x29   :  { %2120 = vmatmul.msk.f32.gmra.mxu1 %vm113_vm2, %v81_v17  ;;  %2125 = vmatmul.msk.f32.gmra.mxu2 %vm113_vm2, %v110_v27 }
  0x2a   :  { %2115 = vmatmul.msk.f32.gmra.mxu0 %vm113_vm2, %v99_v28 }
  0x8e   :  { %v183_v30 = vpop.f32.mrf.mxu1 }
  0x8f   :  { %v143_v32 = vpop.f32.mrf.mxu0 }
  0x90   :  { %v184_v34 = vadd.f32 %v183_v30, %v143_v32 }
  0x94   :  { %v224_v37 = vpop.f32.mrf.mxu2 }
  0x95   :  { %v236_v38 = vadd.f32 %v224_v37, %v184_v34  ;;  %v2648_v37 = vld [vmem:[%s3075_s6 + $0x8] sm:$0xff] }
  0x96   :  { %v186_v39 = vpop.f32.mrf.mxu1  ;;  %492 = vmatpush.msrb.mxu3 %v2648_v37  ;;  %681 = vmatpush.msrb.mxu1 %v2648_v37 }
  0x97   :  { %v244_v40 = vadd.f32 %v2616_v36, %v236_v38  ;;  %v146_v41 = vpop.f32.mrf.mxu0  ;;  %v2653_v38 = vld [vmem:[%s3075_s6] sm:$0xff] }
  0x98   :  { %v187_v42 = vadd.f32 %v186_v39, %v146_v41  ;;  %493 = vmatpush.msrb.mxu3 %v2653_v38  ;;  %682 = vmatpush.msrb.mxu1 %v2653_v38 }
  0x99   :  { %v252_v43 = vrot.slane %v244_v40, 2  ;;  %v253_v44 = vrot.slane %v244_v40, 4  ;;  %v254_v45 = vrot.slane %v244_v40, 6  ;;  %v277_v46 = vsel %vm276_vm4, %v244_v40, -inf }
  0x9a   :  { %v278_v47 = vrot.slane %v277_v46, 4 }
  0x9b   :  { %v284_v48 = vsel %vm276_vm4, %v252_v43, -inf  ;;  %v291_v49 = vsel %vm276_vm4, %v253_v44, -inf  ;;  %v298_v50 = vsel %vm276_vm4, %v254_v45, -inf }
  0x9c   :  { %v279_v51 = vmax.f32 %v277_v46, %v278_v47  ;;  %v285_v52 = vrot.slane %v284_v48, 4  ;;  %v292_v53 = vrot.slane %v291_v49, 4  ;;  %v299_v54 = vrot.slane %v298_v50, 4  ;;  %v227_v55 = vpop.f32.mrf.mxu2 }
  0x9d   :  { %v237_v58 = vadd.f32 %v227_v55, %v187_v42 }
  0x9e   :  { %v189_v59 = vpop.f32.mrf.mxu1  ;;  %v280_v60 = vrot.slane %v279_v51, 2  ;;  %v286_v61 = vmax.f32 %v284_v48, %v285_v52  ;;  %v293_v62 = vmax.f32 %v291_v49, %v292_v53  ;;  %v300_v63 = vmax.f32 %v298_v50, %v299_v54 }
  0x9f   :  { %v245_v0 = vadd.f32 %v2616_v36, %v237_v58  ;;  %v149_v1 = vpop.f32.mrf.mxu0 }
  0xa0   :  { %v281_v2 = vmax.f32 %v279_v51, %v280_v60  ;;  %v287_v3 = vrot.slane %v286_v61, 2  ;;  %v294_v4 = vrot.slane %v293_v62, 2  ;;  %v301_v5 = vrot.slane %v300_v63, 2 }
  0xa1   :  { %v255_v6 = vrot.slane %v245_v0, 2  ;;  %v256_v7 = vrot.slane %v245_v0, 4  ;;  %v257_v8 = vrot.slane %v245_v0, 6  ;;  %v305_v9 = vsel %vm276_vm4, %v245_v0, -inf }
  0xa2   :  { %v282_v10 = vrot.slane %v281_v2, 1  ;;  %v288_v11 = vmax.f32 %v286_v61, %v287_v3  ;;  %v295_v12 = vmax.f32 %v293_v62, %v294_v4  ;;  %v302_v13 = vmax.f32 %v300_v63, %v301_v5 }
  0xa3   :  { %v306_v14 = vrot.slane %v305_v9, 4  ;;  %v312_v15 = vsel %vm276_vm4, %v255_v6, -inf  ;;  %v319_v16 = vsel %vm276_vm4, %v256_v7, -inf  ;;  %v190_v17 = vadd.f32 %v189_v59, %v149_v1 }
  0xa4   :  { %v289_v18 = vrot.slane %v288_v11, 1  ;;  %v296_v19 = vrot.slane %v295_v12, 1  ;;  %v313_v20 = vrot.slane %v312_v15, 4  ;;  %v230_v21 = vpop.f32.mrf.mxu2  ;;  %v320_v23 = vrot.slane %v319_v16, 4 }
  0xa5   :  { %v307_v22 = vmax.f32 %v305_v9, %v306_v14  ;;  %v238_v24 = vadd.f32 %v230_v21, %v190_v17  ;;  %v303_v26 = vrot.slane %v302_v13, 1  ;;  %v283_v27 = vmax.f32 %v281_v2, %v282_v10 }
  0xa6   :  { %v192_v25 = vpop.f32.mrf.mxu1  ;;  %v290_v28 = vmax.f32 %v288_v11, %v289_v18  ;;  %v314_v29 = vmax.f32 %v312_v15, %v313_v20  ;;  %v326_v30 = vsel %vm276_vm4, %v257_v8, -inf  ;;  %v2643_v34 = vmax.f32 %v295_v12, %v296_v19 }
  0xa7   :  { %v308_v31 = vrot.slane %v307_v22, 2  ;;  %v246_v32 = vadd.f32 %v2616_v36, %v238_v24  ;;  %v152_v33 = vpop.f32.mrf.mxu0  ;;  %v321_v35 = vmax.f32 %v319_v16, %v320_v23  ;;  %v2655_v40 = vmax.f32 %v302_v13, %v303_v26 }
  0xa8   :  { %v193_v39 = vadd.f32 %v192_v25, %v152_v33  ;;  %v315_v41 = vrot.slane %v314_v29, 2  ;;  %v327_v42 = vrot.slane %v326_v30, 4  ;;  %v414_v5 = vsel %vm413_vm5, %v290_v28, %v283_v27 }
  0xa9   :  { %v309_v43 = vmax.f32 %v307_v22, %v308_v31  ;;  %v258_v44 = vrot.slane %v246_v32, 2  ;;  %v259_v45 = vrot.slane %v246_v32, 4  ;;  %v260_v46 = vrot.slane %v246_v32, 6 }
  0xaa   :  { %v333_v47 = vsel %vm276_vm4, %v246_v32, -inf  ;;  %v316_v48 = vmax.f32 %v314_v29, %v315_v41  ;;  %v322_v49 = vrot.slane %v321_v35, 2  ;;  %v328_v50 = vmax.f32 %v326_v30, %v327_v42 }
  0xab   :  { %v334_v51 = vrot.slane %v333_v47, 4  ;;  %v340_v52 = vsel %vm276_vm4, %v258_v44, -inf  ;;  %v347_v53 = vsel %vm276_vm4, %v259_v45, -inf  ;;  %v354_v54 = vsel %vm276_vm4, %v260_v46, -inf }
  0xac   :  { %v341_v55 = vrot.slane %v340_v52, 4  ;;  %v348_v58 = vrot.slane %v347_v53, 4  ;;  %v355_v59 = vrot.slane %v354_v54, 4  ;;  %v233_v60 = vpop.f32.mrf.mxu2  ;;  %v310_v61 = vrot.slane %v309_v43, 1 }
  0xad   :  { %v335_v62 = vmax.f32 %v333_v47, %v334_v51  ;;  %v239_v63 = vadd.f32 %v233_v60, %v193_v39  ;;  %v317_v0 = vrot.slane %v316_v48, 1  ;;  %v323_v1 = vmax.f32 %v321_v35, %v322_v49 }
  0xae   :  { %v342_v2 = vmax.f32 %v340_v52, %v341_v55  ;;  %v349_v3 = vmax.f32 %v347_v53, %v348_v58  ;;  %v356_v4 = vmax.f32 %v354_v54, %v355_v59  ;;  %v311_v8 = vmax.f32 %v309_v43, %v310_v61 }
  0xaf   :  { %v336_v6 = vrot.slane %v335_v62, 2  ;;  %v247_v7 = vadd.f32 %v2616_v36, %v239_v63  ;;  %v318_v9 = vmax.f32 %v316_v48, %v317_v0  ;;  %v324_v13 = vrot.slane %v323_v1, 1 }
  0xb0   :  { %v343_v10 = vrot.slane %v342_v2, 2  ;;  %v350_v11 = vrot.slane %v349_v3, 2  ;;  %v357_v12 = vrot.slane %v356_v4, 2  ;;  %v329_v17 = vrot.slane %v328_v50, 2 }
  0xb1   :  { %v337_v14 = vmax.f32 %v335_v62, %v336_v6  ;;  %v261_v15 = vrot.slane %v247_v7, 2  ;;  %v262_v16 = vrot.slane %v247_v7, 4  ;;  %v263_v20 = vrot.slane %v247_v7, 6 }
  0xb2   :  { %v344_v18 = vmax.f32 %v342_v2, %v343_v10  ;;  %v351_v19 = vmax.f32 %v349_v3, %v350_v11  ;;  %v361_v21 = vsel %vm276_vm4, %v247_v7, -inf  ;;  %v358_v22 = vmax.f32 %v356_v4, %v357_v12 }
  0xb3   :  { %v362_v36 = vrot.slane %v361_v21, 4  ;;  %v368_v23 = vsel %vm276_vm4, %v261_v15, -inf  ;;  %v375_v24 = vsel %vm276_vm4, %v262_v16, -inf  ;;  %v338_v29 = vrot.slane %v337_v14, 1 }
  0xb4   :  { %v345_v25 = vrot.slane %v344_v18, 1  ;;  %v352_v26 = vrot.slane %v351_v19, 1  ;;  %v369_v27 = vrot.slane %v368_v23, 4  ;;  %v376_v28 = vrot.slane %v375_v24, 4 }
  0xb5   :  { %v363_v30 = vmax.f32 %v361_v21, %v362_v36  ;;  %v325_v31 = vmax.f32 %v323_v1, %v324_v13  ;;  %v330_v32 = vmax.f32 %v328_v50, %v329_v17  ;;  %v416_v39 = vsel %vm415_vm6, %v2643_v34, %v414_v5 }
  0xb6   :  { %v346_v33 = vmax.f32 %v344_v18, %v345_v25  ;;  %v370_v35 = vmax.f32 %v368_v23, %v369_v27  ;;  %v353_v41 = vmax.f32 %v351_v19, %v352_v26  ;;  %v418_v44 = vsel %vm417_vm7, %v2655_v40, %v416_v39  ;;  %v2184_v18 = vld [vmem:[%s3076_s7] ss:$0 sm:$0xff]  ;;  %s2476_s7 = smov 32  }
  0xb7   :  { %v364_v42 = vrot.slane %v363_v30, 2  ;;  %v331_v43 = vrot.slane %v330_v32, 1  ;;  %v359_v45 = vrot.slane %v358_v22, 1  ;;  %v420_v46 = vsel %vm419_vm8, %v311_v8, %v418_v44 }
  0xb8   :  { %v371_v47 = vrot.slane %v370_v35, 2  ;;  %v377_v48 = vmax.f32 %v375_v24, %v376_v28  ;;  %v382_v49 = vsel %vm276_vm4, %v263_v20, -inf  ;;  %v339_v51 = vmax.f32 %v337_v14, %v338_v29 }
  0xb9   :  { %v365_v50 = vmax.f32 %v363_v30, %v364_v42  ;;  %v332_v52 = vmax.f32 %v330_v32, %v331_v43  ;;  %v422_v53 = vsel %vm421_vm9, %v318_v9, %v420_v46  ;;  %v383_v58 = vrot.slane %v382_v49, 4 }
  0xba   :  { %v424_v34 = vsel %vm423_vm10, %v325_v31, %v422_v53  ;;  %v372_v54 = vmax.f32 %v370_v35, %v371_v47  ;;  %v378_v55 = vrot.slane %v377_v48, 2  ;;  %v360_v40 = vmax.f32 %v358_v22, %v359_v45 }
  0xbb   :  { %v426_v59 = vsel %vm425_vm11, %v332_v52, %v424_v34  ;;  %v366_v60 = vrot.slane %v365_v50, 1  ;;  %v427_v61 = vsel %vm413_vm5, %v346_v33, %v339_v51  ;;  %v384_v0 = vmax.f32 %v382_v49, %v383_v58 }
  0xbc   :  { %2126 = vmatmul.msk.f32.vlgmr.msra.gmra.mxu3 %vm434_vm12, %v426_v59  ;;  %v373_v62 = vrot.slane %v372_v54, 1  ;;  %v379_v63 = vmax.f32 %v377_v48, %v378_v55  ;;  %v428_v1 = vsel %vm415_vm6, %v353_v41, %v427_v61  ;;  %v2474_v15 = vmov 0.0  }
  0xbd   :  { %v367_v2 = vmax.f32 %v365_v50, %v366_v60  ;;  %v385_v5 = vrot.slane %v384_v0, 2  ;;  %v429_v6 = vsel %vm417_vm7, %v360_v40, %v428_v1 }
  0xbe   :  { %v374_v3 = vmax.f32 %v372_v54, %v373_v62  ;;  %v380_v4 = vrot.slane %v379_v63, 1 }
  0xbf   :  { %v430_v7 = vsel %vm419_vm8, %v367_v2, %v429_v6  ;;  %v386_v9 = vmax.f32 %v384_v0, %v385_v5  ;;  %v2710_v5 = vld [vmem:[#allocation2 + $0x18] sm:$0xff]  ;;  %v2712_v6 = vld [vmem:[#allocation2 + $0x10] sm:$0xff] }
  0xc0   :  { %v381_v8 = vmax.f32 %v379_v63, %v380_v4  ;;  %v431_v10 = vsel %vm421_vm9, %v374_v3, %v430_v7  ;;  %601 = vmatpush.msra.mxu3 %v2710_v5  ;;  %793 = vmatpush.msrb.mxu2 %v2710_v5  ;;  %v2716_v7 = vld [vmem:[#allocation2 + $0x8] sm:$0xff] }
  0xc1   :  { %v387_v11 = vrot.slane %v386_v9, 1  ;;  %992 = vmatpush.msra.mxu1 %v2710_v5 }
  0xc2   :  { %v432_v12 = vsel %vm423_vm10, %v381_v8, %v431_v10  ;;  %602 = vmatpush.msra.mxu3 %v2712_v6  ;;  %794 = vmatpush.msrb.mxu2 %v2712_v6  ;;  %v2721_v8 = vld [vmem:[#allocation2] sm:$0xff] }
  0xc3   :  { %v388_v13 = vmax.f32 %v386_v9, %v387_v11  ;;  %993 = vmatpush.msra.mxu1 %v2712_v6 }
  0xc4   :  { %603 = vmatpush.msra.mxu3 %v2716_v7  ;;  %795 = vmatpush.msrb.mxu2 %v2716_v7 }
  0xc5   :  { %v433_v14 = vsel %vm425_vm11, %v388_v13, %v432_v12  ;;  %994 = vmatpush.msra.mxu1 %v2716_v7 }
  0xc6   :  { %2127 = vmatmul.msk.f32.gmra.mxu3 %vm434_vm12, %v433_v14  ;;  %796 = vmatpush.msrb.mxu2 %v2721_v8 }
  0xc7   :  { %604 = vmatpush.msra.mxu3 %v2721_v8  ;;  %995 = vmatpush.msra.mxu1 %v2721_v8 }
  0xce   :  { %494 = vmatmul.f32.vlgmr.msrb.gmra.mxu3 %v2474_v15 }
 0x13f   :  { %v456_v16 = vpop.f32.mrf.mxu3 }
 0x140   :  { %v2695_v36 = vadd.f32 %v2184_v18, %v456_v16  ;;  %v2732_v16 = vld [vmem:[#allocation5 + $0x18] sm:$0xff] }
 0x141   :  { %621 = vmatpush.msrb.mxu0 %v2732_v16  ;;  %818 = vmatpush.msrb.mxu3 %v2732_v16 }
 0x142   :  { %1017 = vmatpush.msra.mxu2 %v2732_v16 }
 0x149   :  { %v459_v17 = vpop.f32.mrf.mxu3 }
 0x14a   :  { %v2692_v20 = vadd.f32 %v2184_v18, %v459_v17  ;;  %v2734_v17 = vld [vmem:[#allocation5 + $0x10] sm:$0xff]  ;;  %v2738_v18 = vld [vmem:[#allocation5 + $0x8] sm:$0xff] }
 0x14b   :  { %622 = vmatpush.msrb.mxu0 %v2734_v17  ;;  %819 = vmatpush.msrb.mxu3 %v2734_v17 }
 0x14c   :  { %1018 = vmatpush.msra.mxu2 %v2734_v17 }
 0x14d   :  { %623 = vmatpush.msrb.mxu0 %v2738_v18  ;;  %820 = vmatpush.msrb.mxu3 %v2738_v18 }
 0x14e   :  { %1019 = vmatpush.msra.mxu2 %v2738_v18 }
 0x151   :  { %v495_v19 = vpop.f32.mrf.mxu3 }
 0x152   :  { %v499_v21 = vrot.slane %v495_v19, 1  ;;  %v502_v23 = vadd.f32 %v495_v19, %v2695_v36  ;;  %v2743_v19 = vld [vmem:[#allocation5] sm:$0xff] }
 0x153   :  { %624 = vmatpush.msrb.mxu0 %v2743_v19  ;;  %821 = vmatpush.msrb.mxu3 %v2743_v19 }
 0x154   :  { %v503_v22 = vadd.f32 %v499_v21, %v2692_v20  ;;  %v2128_v27 = vmul.f32 -1.442695, %v502_v23  ;;  %625 = vmatmul.f32.vlgmr.msrb.gmra.mxu0 %v2474_v15  ;;  %1020 = vmatpush.msra.mxu2 %v2743_v19 }
 0x155   :  { %876 = vmatpush.msra.mxu0 %v2626_v56 }
 0x156   :  { %2187 = vtanh.f32 %v503_v22  ;;  %v2129_v26 = vmul.f32 -1.442695, %v503_v22 }
 0x157   :  { %2189 = vtanh.f32 %v502_v23  ;;  %877 = vmatpush.msra.mxu0 %v2631_v57 }
 0x158   :  { %2191 = vpow2.f32 %v2129_v26 }
 0x159   :  { %2193 = vpow2.f32 %v2128_v27  ;;  %878 = vmatpush.msra.mxu0 %v2648_v37 }
 0x15b   :  { %879 = vmatpush.msra.mxu0 %v2653_v38 }
 0x15c   :  { %v2188_v24 = vpop.eup %2187 }
 0x15d   :  { %550 = vrot.lane.b32.xlu0 %v2188_v24, %s2475_s2  ;;  %v2190_v25 = vpop.eup %2189  ;;  %1191 = vmatpush.msrb.mxu0 %v2710_v5 }
 0x15e   :  { %v2192_v28 = vpop.eup %2191 }
 0x15f   :  { %v511_v29 = vadd.f32 1.0, %v2192_v28  ;;  %v2194_v30 = vpop.eup %2193  ;;  %1192 = vmatpush.msrb.mxu0 %v2712_v6 }
 0x160   :  { %v510_v31 = vadd.f32 1.0, %v2194_v30 }
 0x161   :  { %2195 = vrcp.f32 %v511_v29  ;;  %v538_v45 = vand.u32 2147483648, %v511_v29  ;;  %vm532_vm14 = vweird.f32 %v511_v29  ;;  %v536_v46 = vand.u32 2147483647, %v511_v29  ;;  %1193 = vmatpush.msrb.mxu0 %v2716_v7 }
 0x162   :  { %2197 = vrcp.f32 %v510_v31  ;;  %v523_v34 = vand.u32 2147483648, %v510_v31  ;;  %vm517_vm2 = vweird.f32 %v510_v31  ;;  %v521_v54 = vand.u32 2147483647, %v510_v31 }
 0x163   :  { %v539_v49 = vor.u32 1.1754944e-38, %v538_v45  ;;  %vm537_vm0 = vcmp.eq.f32.partialorder %v536_v46, 8.507059e+37  ;;  %1194 = vmatpush.msrb.mxu0 %v2721_v8 }
 0x164   :  { %v524_v58 = vor.u32 1.1754944e-38, %v523_v34  ;;  %vm522_vm4 = vcmp.eq.f32.partialorder %v521_v54, 8.507059e+37 }
 0x165   :  { %548 = vrot.lane.b32.xlu0 %v2190_v25, %s2475_s2  ;;  %v2776_v25 = vld [vmem:[%s3079_s10] ss:$0 sm:$0xff] }
 0x167   :  { %v2196_v32 = vpop.eup %2195 }
 0x168   :  { %v528_v33 = vmul.f32 %v2196_v32, %v511_v29  ;;  %v2198_v39 = vpop.eup %2197  ;;  %vm533_vm13 = vweird.f32 %v2196_v32 }
 0x169   :  { %v513_v42 = vmul.f32 %v2198_v39, %v510_v31  ;;  %vm534_vm15 = vmor %vm532_vm14, %vm533_vm13  ;;  %vm518_vm1 = vweird.f32 %v2198_v39 }
 0x16a   :  { %v529_v35 = vsub.f32 1.0, %v528_v33  ;;  %vm519_vm3 = vmor %vm517_vm2, %vm518_vm1 }
 0x16b   :  { %v514_v44 = vsub.f32 1.0, %v513_v42 }
 0x16c   :  { %v530_v41 = vmul.f32 %v2196_v32, %v529_v35 }
 0x16d   :  { %v515_v48 = vmul.f32 %v2198_v39, %v514_v44 }
 0x16e   :  { %v531_v43 = vadd.f32 %v2196_v32, %v530_v41 }
 0x16f   :  { %v516_v53 = vadd.f32 %v2198_v39, %v515_v48 }
 0x170   :  { %v535_v47 = vsel %vm534_vm15, %v2196_v32, %v531_v43 }
 0x171   :  { %v540_v50 = vsel %vm537_vm0, %v539_v49, %v535_v47  ;;  %v520_v55 = vsel %vm519_vm3, %v2198_v39, %v516_v53 }
 0x172   :  { %v525_v59 = vsel %vm522_vm4, %v524_v58, %v520_v55  ;;  %v545_v61 = vmul.f32 0.0, %v540_v50 }
 0x173   :  { %v544_v0 = vmul.f32 0.0, %v525_v59 }
 0x1cf   :  { %v551_v51 = vpop.permute.xlu0 %550 }
 0x1d0   :  { %v555_v52 = vmul.f32 %v551_v51, %v540_v50 }
 0x1d1   :  { %v626_v27 = vpop.f32.mrf.mxu0 }
 0x1d2   :  { %560 = vrot.lane.b32.xlu1 %v555_v52, %s2476_s7 }
 0x1d7   :  { %v549_v40 = vpop.permute.xlu0 %548 }
 0x1d8   :  { %v554_v60 = vmul.f32 %v549_v40, %v525_v59 }
 0x1da   :  { %558 = vrot.lane.b32.xlu1 %v554_v60, %s2476_s7 }
 0x244   :  { %v561_v62 = vpop.permute.xlu1 %560 }
 0x245   :  { %v2702_v63 = vadd.f32 %v561_v62, %v545_v61 }
 0x247   :  { %2199 = vtanh.f32 %v2702_v63 }
 0x24c   :  { %v559_v1 = vpop.permute.xlu1 %558 }
 0x24d   :  { %v2200_v2 = vpop.eup %2199  ;;  %v2705_v3 = vadd.f32 %v559_v1, %v544_v0 }
 0x24e   :  { %572 = vrot.lane.b32.xlu2 %v2200_v2, %s2475_s2 }
 0x24f   :  { %2201 = vtanh.f32 %v2705_v3 }
 0x255   :  { %v2202_v4 = vpop.eup %2201 }
 0x256   :  { %570 = vrot.lane.b32.xlu2 %v2202_v4, %s2475_s2 }
 0x2a8   :  { %v573_v9 = vpop.permute.xlu2 %572 }
 0x2a9   :  { %v577_v10 = vmul.f32 %v573_v9, %v540_v50 }
 0x2ab   :  { %v583_v12 = vrot.slane %v577_v10, 7 }
 0x2b0   :  { %v571_v11 = vpop.permute.xlu2 %570 }
 0x2b1   :  { %v576_v13 = vmul.f32 %v571_v11, %v525_v59 }
 0x2b3   :  { %v584_v14 = vsel %vm413_vm5, %v583_v12, %v576_v13 }
 0x2b4   :  { %585 = vrot.lane.b32.xlu0 %v584_v14, %s2476_s7 }
 0x326   :  { %v586_v21 = vpop.permute.xlu0 %585 }
 0x327   :  { %2130 = vmatmul.msk.f32.vlgmr.msra.gmra.mxu3 %vm434_vm12, %v586_v21  ;;  %2132 = vmatmul.msk.f32.vlgmr.msrb.gmra.mxu1 %vm434_vm12, %v586_v21 }
 0x328   :  { %1075 = vmatpush.msra.mxu3 %v2626_v56  ;;  %1216 = vmatpush.msrb.mxu1 %v2732_v16 }
 0x32a   :  { %1076 = vmatpush.msra.mxu3 %v2631_v57  ;;  %1217 = vmatpush.msrb.mxu1 %v2734_v17 }
 0x32c   :  { %1077 = vmatpush.msra.mxu3 %v2648_v37  ;;  %1218 = vmatpush.msrb.mxu1 %v2738_v18 }
 0x32e   :  { %1078 = vmatpush.msra.mxu3 %v2653_v38  ;;  %1219 = vmatpush.msrb.mxu1 %v2743_v19 }
 0x3a4   :  { %v684_v15 = vpop.f32.mrf.mxu1 }
 0x3a5   :  { %v688_v22 = vrot.slane %v684_v15, 7  ;;  %v692_v23 = vadd.f32 %v684_v15, %v2692_v20 }
 0x3a7   :  { %v691_v24 = vadd.f32 %v688_v22, %v2695_v36  ;;  %2203 = vtanh.f32 %v692_v23  ;;  %v2134_v33 = vmul.f32 -1.442695, %v692_v23 }
 0x3a9   :  { %2205 = vtanh.f32 %v691_v24  ;;  %v2133_v43 = vmul.f32 -1.442695, %v691_v24 }
 0x3aa   :  { %v606_v26 = vpop.f32.mrf.mxu3 }
 0x3ab   :  { %v607_v28 = vadd.f32 %v2776_v25, %v606_v26 }
 0x3ad   :  { %v2204_v29 = vpop.eup %2203  ;;  %v629_v30 = vadd.f32 %v626_v27, %v607_v28 }
 0x3ae   :  { %745 = vrot.lane.b32.xlu2 %v2204_v29, %s2475_s2 }
 0x3af   :  { %2207 = vtanh.f32 %v629_v30  ;;  %v2206_v31 = vpop.eup %2205  ;;  %v2131_v45 = vmul.f32 -1.442695, %v629_v30 }
 0x3b0   :  { %743 = vrot.lane.b32.xlu1 %v2206_v31, %s2475_s2  ;;  %2209 = vpow2.f32 %v2134_v33  ;;  %v736_v31 = vrot.slane %v2702_v63, 7 }
 0x3b5   :  { %v2208_v32 = vpop.eup %2207 }
 0x3b6   :  { %652 = vrot.lane.b32.xlu0 %v2208_v32, %s2475_s2  ;;  %v2210_v35 = vpop.eup %2209 }
 0x3b7   :  { %v700_v39 = vadd.f32 1.0, %v2210_v35 }
 0x3b9   :  { %2211 = vrcp.f32 %v700_v39  ;;  %v727_v49 = vand.u32 2147483648, %v700_v39  ;;  %vm721_vm7 = vweird.f32 %v700_v39  ;;  %v725_v50 = vand.u32 2147483647, %v700_v39 }
 0x3ba   :  { %2213 = vpow2.f32 %v2133_v43 }
 0x3bb   :  { %2215 = vpow2.f32 %v2131_v45  ;;  %v728_v34 = vor.u32 1.1754944e-38, %v727_v49  ;;  %vm726_vm9 = vcmp.eq.f32.partialorder %v725_v50, 8.507059e+37 }
 0x3bf   :  { %v2212_v41 = vpop.eup %2211 }
 0x3c0   :  { %v717_v42 = vmul.f32 %v2212_v41, %v700_v39  ;;  %v2214_v47 = vpop.eup %2213  ;;  %vm722_vm6 = vweird.f32 %v2212_v41 }
 0x3c1   :  { %v699_v51 = vadd.f32 1.0, %v2214_v47  ;;  %vm723_vm8 = vmor %vm721_vm7, %vm722_vm6  ;;  %v2216_v52 = vpop.eup %2215 }
 0x3c2   :  { %v718_v44 = vsub.f32 1.0, %v717_v42  ;;  %v633_v54 = vadd.f32 1.0, %v2216_v52 }
 0x3c3   :  { %2217 = vrcp.f32 %v699_v51  ;;  %v712_v9 = vand.u32 2147483648, %v699_v51  ;;  %vm706_vm11 = vweird.f32 %v699_v51  ;;  %v710_v11 = vand.u32 2147483647, %v699_v51 }
 0x3c4   :  { %v719_v46 = vmul.f32 %v2212_v41, %v718_v44  ;;  %2219 = vrcp.f32 %v633_v54  ;;  %v645_v21 = vand.u32 2147483648, %v633_v54  ;;  %vm639_vm0 = vweird.f32 %v633_v54 }
 0x3c5   :  { %v713_v13 = vor.u32 1.1754944e-38, %v712_v9  ;;  %vm711_vm15 = vcmp.eq.f32.partialorder %v710_v11, 8.507059e+37  ;;  %v643_v23 = vand.u32 2147483647, %v633_v54 }
 0x3c6   :  { %v720_v48 = vadd.f32 %v2212_v41, %v719_v46  ;;  %v646_v27 = vor.u32 1.1754944e-38, %v645_v21 }
 0x3c7   :  { %vm644_vm2 = vcmp.eq.f32.partialorder %v643_v23, 8.507059e+37 }
 0x3c8   :  { %v724_v53 = vsel %vm723_vm8, %v2212_v41, %v720_v48  ;;  %v735_v41 = vrot.slane %v2705_v3, 7 }
 0x3c9   :  { %v729_v58 = vsel %vm726_vm9, %v728_v34, %v724_v53  ;;  %v2218_v40 = vpop.eup %2217 }
 0x3ca   :  { %v702_v60 = vmul.f32 %v2218_v40, %v699_v51  ;;  %v2220_v61 = vpop.eup %2219  ;;  %vm707_vm10 = vweird.f32 %v2218_v40  ;;  %v740_v32 = vmul.f32 %v736_v31, %v729_v58 }
 0x3cb   :  { %v635_v0 = vmul.f32 %v2220_v61, %v633_v54  ;;  %vm708_vm13 = vmor %vm706_vm11, %vm707_vm10  ;;  %vm640_vm14 = vweird.f32 %v2220_v61 }
 0x3cc   :  { %v703_v62 = vsub.f32 1.0, %v702_v60  ;;  %vm641_vm1 = vmor %vm639_vm0, %vm640_vm14 }
 0x3cd   :  { %v636_v2 = vsub.f32 1.0, %v635_v0 }
 0x3ce   :  { %v704_v1 = vmul.f32 %v2218_v40, %v703_v62 }
 0x3cf   :  { %v637_v10 = vmul.f32 %v2220_v61, %v636_v2 }
 0x3d0   :  { %v705_v4 = vadd.f32 %v2218_v40, %v704_v1 }
 0x3d1   :  { %v638_v14 = vadd.f32 %v2220_v61, %v637_v10 }
 0x3d2   :  { %v709_v12 = vsel %vm708_vm13, %v2218_v40, %v705_v4 }
 0x3d3   :  { %v714_v22 = vsel %vm711_vm15, %v713_v13, %v709_v12  ;;  %v642_v26 = vsel %vm641_vm1, %v2220_v61, %v638_v14 }
 0x3d4   :  { %v647_v29 = vsel %vm644_vm2, %v646_v27, %v642_v26  ;;  %v739_v42 = vmul.f32 %v735_v41, %v714_v22 }
 0x3d5   :  { %v650_v45 = vmul.f32 0.0, %v647_v29 }
 0x408   :  { %v746_v55 = vpop.permute.xlu2 %745 }
 0x409   :  { %v750_v59 = vmul.f32 %v746_v55, %v729_v58 }
 0x40b   :  { %755 = vrot.lane.b32.xlu2 %v750_v59, %s2476_s7 }
 0x422   :  { %v744_v15 = vpop.permute.xlu1 %743 }
 0x423   :  { %v749_v24 = vmul.f32 %v744_v15, %v714_v22 }
 0x425   :  { %753 = vrot.lane.b32.xlu1 %v749_v24, %s2476_s7 }
 0x428   :  { %v653_v28 = vpop.permute.xlu0 %652 }
 0x429   :  { %v655_v30 = vmul.f32 %v653_v28, %v647_v29 }
 0x42b   :  { %657 = vrot.lane.b32.xlu0 %v655_v30, %s2476_s7 }
 0x465   :  { %v756_v33 = vpop.permute.xlu2 %755 }
 0x466   :  { %v2786_v35 = vadd.f32 %v756_v33, %v740_v32 }
 0x468   :  { %2221 = vtanh.f32 %v2786_v35 }
 0x46e   :  { %v2222_v39 = vpop.eup %2221 }
 0x46f   :  { %767 = vrot.lane.b32.xlu2 %v2222_v39, %s2475_s2 }
 0x497   :  { %v754_v43 = vpop.permute.xlu1 %753 }
 0x498   :  { %v2791_v44 = vadd.f32 %v754_v43, %v739_v42 }
 0x49a   :  { %2223 = vtanh.f32 %v2791_v44 }
 0x49d   :  { %v658_v46 = vpop.permute.xlu0 %657 }
 0x49e   :  { %v2794_v63 = vadd.f32 %v658_v46, %v650_v45 }
 0x4a0   :  { %2225 = vtanh.f32 %v2794_v63  ;;  %v2224_v47 = vpop.eup %2223 }
 0x4a1   :  { %765 = vrot.lane.b32.xlu1 %v2224_v47, %s2475_s2 }
 0x4a6   :  { %v2226_v48 = vpop.eup %2225 }
 0x4a7   :  { %663 = vrot.lane.b32.xlu0 %v2226_v48, %s2475_s2 }
 0x4c9   :  { %v768_v49 = vpop.permute.xlu2 %767 }
 0x4ca   :  { %v772_v50 = vmul.f32 %v768_v49, %v729_v58 }
 0x513   :  { %v766_v3 = vpop.permute.xlu1 %765 }
 0x514   :  { %v771_v51 = vmul.f32 %v766_v3, %v714_v22 }
 0x516   :  { %v775_v52 = vrot.slane %v771_v51, 1 }
 0x518   :  { %v776_v53 = vsel %vm413_vm5, %v772_v50, %v775_v52 }
 0x519   :  { %v664_v34 = vpop.permute.xlu0 %663  ;;  %777 = vrot.lane.b32.xlu1 %v776_v53, %s2476_s7 }
 0x51a   :  { %v666_v54 = vmul.f32 %v664_v34, %v647_v29 }
 0x51c   :  { %802 = vrot.lane.b32.xlu2 %v666_v54, %s2476_s7 }
 0x576   :  { %v803_v55 = vpop.permute.xlu2 %802 }
 0x577   :  { %2136 = vmatmul.msk.f32.vlgmr.msrb.gmra.mxu3 %vm434_vm12, %v803_v55 }
 0x578   :  { %1390 = vmatpush.msrb.mxu3 %v2710_v5 }
 0x57a   :  { %1391 = vmatpush.msrb.mxu3 %v2712_v6 }
 0x57c   :  { %1392 = vmatpush.msrb.mxu3 %v2716_v7 }
 0x57e   :  { %1393 = vmatpush.msrb.mxu3 %v2721_v8 }
 0x58b   :  { %v778_v58 = vpop.permute.xlu1 %777 }
 0x58c   :  { %2135 = vmatmul.msk.f32.vlgmr.msrb.gmra.mxu2 %vm434_vm12, %v778_v58  ;;  %2138 = vmatmul.msk.f32.vlgmr.msra.gmra.mxu0 %vm434_vm12, %v778_v58 }
 0x58d   :  { %1274 = vmatpush.msrb.mxu2 %v2626_v56  ;;  %1415 = vmatpush.msra.mxu0 %v2732_v16 }
 0x58f   :  { %1275 = vmatpush.msrb.mxu2 %v2631_v57  ;;  %1416 = vmatpush.msra.mxu0 %v2734_v17 }
 0x591   :  { %1276 = vmatpush.msrb.mxu2 %v2648_v37  ;;  %1417 = vmatpush.msra.mxu0 %v2738_v18 }
 0x593   :  { %1277 = vmatpush.msrb.mxu2 %v2653_v38  ;;  %1418 = vmatpush.msra.mxu0 %v2743_v19 }
 0x5fa   :  { %v823_v0 = vpop.f32.mrf.mxu3 }
 0x609   :  { %v881_v59 = vpop.f32.mrf.mxu0 }
 0x60a   :  { %v885_v40 = vrot.slane %v881_v59, 6  ;;  %v886_v60 = vrot.slane %v881_v59, 7 }
 0x60c   :  { %v889_v61 = vadd.f32 %v885_v40, %v2695_v36  ;;  %v890_v56 = vadd.f32 %v886_v60, %v2692_v20 }
 0x60e   :  { %2227 = vtanh.f32 %v889_v61  ;;  %v2139_v13 = vmul.f32 -1.442695, %v889_v61  ;;  %v2140_v14 = vmul.f32 -1.442695, %v890_v56 }
 0x60f   :  { %2229 = vtanh.f32 %v890_v56  ;;  %v798_v57 = vpop.f32.mrf.mxu2 }
 0x610   :  { %v799_v62 = vadd.f32 %v2776_v25, %v798_v57 }
 0x612   :  { %v826_v1 = vadd.f32 %v823_v0, %v799_v62 }
 0x614   :  { %v2228_v2 = vpop.eup %2227  ;;  %2231 = vtanh.f32 %v826_v1  ;;  %v2137_v10 = vmul.f32 -1.442695, %v826_v1 }
 0x615   :  { %v2230_v4 = vpop.eup %2229  ;;  %941 = vrot.lane.b32.xlu0 %v2228_v2, %s2475_s2 }
 0x616   :  { %943 = vrot.lane.b32.xlu1 %v2230_v4, %s2475_s2  ;;  %2233 = vpow2.f32 %v2137_v10 }
 0x61a   :  { %v2232_v9 = vpop.eup %2231 }
 0x61b   :  { %849 = vrot.lane.b32.xlu2 %v2232_v9, %s2475_s2 }
 0x61c   :  { %v2234_v11 = vpop.eup %2233 }
 0x61d   :  { %v830_v12 = vadd.f32 1.0, %v2234_v11  ;;  %v933_v11 = vrot.slane %v2791_v44, 7 }
 0x61f   :  { %2235 = vrcp.f32 %v830_v12  ;;  %v842_v30 = vand.u32 2147483648, %v830_v12  ;;  %vm836_vm4 = vweird.f32 %v830_v12  ;;  %v840_v31 = vand.u32 2147483647, %v830_v12 }
 0x620   :  { %2237 = vpow2.f32 %v2139_v13 }
 0x621   :  { %2239 = vpow2.f32 %v2140_v14  ;;  %v843_v41 = vor.u32 1.1754944e-38, %v842_v30  ;;  %vm841_vm7 = vcmp.eq.f32.partialorder %v840_v31, 8.507059e+37 }
 0x625   :  { %v2236_v21 = vpop.eup %2235 }
 0x626   :  { %v832_v15 = vmul.f32 %v2236_v21, %v830_v12  ;;  %v2238_v22 = vpop.eup %2237  ;;  %vm837_vm3 = vweird.f32 %v2236_v21  ;;  %v934_v12 = vrot.slane %v2786_v35, 7 }
 0x627   :  { %v2240_v23 = vpop.eup %2239  ;;  %v897_v26 = vadd.f32 1.0, %v2238_v22  ;;  %vm838_vm6 = vmor %vm836_vm4, %vm837_vm3 }
 0x628   :  { %v833_v24 = vsub.f32 1.0, %v832_v15  ;;  %v898_v27 = vadd.f32 1.0, %v2240_v23 }
 0x629   :  { %2241 = vrcp.f32 %v897_v26  ;;  %v910_v53 = vand.u32 2147483648, %v897_v26  ;;  %vm904_vm10 = vweird.f32 %v897_v26  ;;  %v908_v54 = vand.u32 2147483647, %v897_v26 }
 0x62a   :  { %v834_v28 = vmul.f32 %v2236_v21, %v833_v24  ;;  %2243 = vrcp.f32 %v898_v27  ;;  %v925_v34 = vand.u32 2147483648, %v898_v27  ;;  %vm919_vm11 = vweird.f32 %v898_v27 }
 0x62b   :  { %v923_v55 = vand.u32 2147483647, %v898_v27  ;;  %v911_v40 = vor.u32 1.1754944e-38, %v910_v53  ;;  %vm909_vm15 = vcmp.eq.f32.partialorder %v908_v54, 8.507059e+37 }
 0x62c   :  { %v835_v29 = vadd.f32 %v2236_v21, %v834_v28  ;;  %v926_v60 = vor.u32 1.1754944e-38, %v925_v34 }
 0x62d   :  { %vm924_vm0 = vcmp.eq.f32.partialorder %v923_v55, 8.507059e+37 }
 0x62e   :  { %v839_v39 = vsel %vm838_vm6, %v2236_v21, %v835_v29 }
 0x62f   :  { %v2242_v32 = vpop.eup %2241  ;;  %v844_v45 = vsel %vm841_vm7, %v843_v41, %v839_v39  ;;  %v2854_v41 = vld [vmem:[%s3075_s6 + $0x18] sm:$0xff] }
 0x630   :  { %v2244_v33 = vpop.eup %2243  ;;  %v900_v42 = vmul.f32 %v2242_v32, %v897_v26  ;;  %vm905_vm8 = vweird.f32 %v2242_v32  ;;  %v847_v2 = vmul.f32 %v844_v45, %v2794_v63 }
 0x631   :  { %v915_v46 = vmul.f32 %v2244_v33, %v898_v27  ;;  %vm920_vm9 = vweird.f32 %v2244_v33  ;;  %vm906_vm13 = vmor %vm904_vm10, %vm905_vm8 }
 0x632   :  { %v901_v48 = vsub.f32 1.0, %v900_v42  ;;  %vm921_vm14 = vmor %vm919_vm11, %vm920_vm9  ;;  %v2861_v42 = vld [vmem:[%s3075_s6 + $0x10] sm:$0xff] }
 0x633   :  { %v916_v49 = vsub.f32 1.0, %v915_v46 }
 0x634   :  { %v902_v3 = vmul.f32 %v2242_v32, %v901_v48 }
 0x635   :  { %v917_v51 = vmul.f32 %v2244_v33, %v916_v49 }
 0x636   :  { %v903_v50 = vadd.f32 %v2242_v32, %v902_v3 }
 0x637   :  { %v918_v52 = vadd.f32 %v2244_v33, %v917_v51 }
 0x638   :  { %v907_v58 = vsel %vm906_vm13, %v2242_v32, %v903_v50 }
 0x639   :  { %v922_v59 = vsel %vm921_vm14, %v2244_v33, %v918_v52  ;;  %v912_v61 = vsel %vm909_vm15, %v911_v40, %v907_v58 }
 0x63a   :  { %v927_v62 = vsel %vm924_vm0, %v926_v60, %v922_v59  ;;  %v937_v13 = vmul.f32 %v933_v11, %v912_v61 }
 0x63b   :  { %v938_v14 = vmul.f32 %v934_v12, %v927_v62 }
 0x675   :  { %v850_v43 = vpop.permute.xlu2 %849 }
 0x676   :  { %v852_v47 = vmul.f32 %v850_v43, %v844_v45 }
 0x678   :  { %854 = vrot.lane.b32.xlu2 %v852_v47, %s2476_s7 }
 0x687   :  { %v942_v56 = vpop.permute.xlu0 %941 }
 0x688   :  { %v944_v57 = vpop.permute.xlu1 %943  ;;  %v947_v0 = vmul.f32 %v942_v56, %v912_v61 }
 0x689   :  { %v948_v1 = vmul.f32 %v944_v57, %v927_v62 }
 0x68a   :  { %951 = vrot.lane.b32.xlu0 %v947_v0, %s2476_s7 }
 0x68b   :  { %953 = vrot.lane.b32.xlu1 %v948_v1, %s2476_s7 }
 0x6d2   :  { %v855_v4 = vpop.permute.xlu2 %854 }
 0x6d3   :  { %v2827_v9 = vadd.f32 %v855_v4, %v847_v2 }
 0x6d5   :  { %2245 = vtanh.f32 %v2827_v9 }
 0x6db   :  { %v2246_v10 = vpop.eup %2245 }
 0x6dc   :  { %860 = vrot.lane.b32.xlu2 %v2246_v10, %s2475_s2 }
 0x6fc   :  { %v952_v21 = vpop.permute.xlu0 %951 }
 0x6fd   :  { %v954_v15 = vpop.permute.xlu1 %953  ;;  %v2833_v22 = vadd.f32 %v952_v21, %v937_v13 }
 0x6fe   :  { %v2835_v23 = vadd.f32 %v954_v15, %v938_v14 }
 0x6ff   :  { %2247 = vtanh.f32 %v2833_v22 }
 0x700   :  { %2249 = vtanh.f32 %v2835_v23 }
 0x705   :  { %v2248_v63 = vpop.eup %2247 }
 0x706   :  { %v2250_v24 = vpop.eup %2249  ;;  %963 = vrot.lane.b32.xlu0 %v2248_v63, %s2475_s2 }
 0x707   :  { %965 = vrot.lane.b32.xlu1 %v2250_v24, %s2475_s2 }
 0x736   :  { %v861_v44 = vpop.permute.xlu2 %860 }
 0x737   :  { %v863_v35 = vmul.f32 %v861_v44, %v844_v45 }
 0x739   :  { %1001 = vrot.lane.b32.xlu1 %v863_v35, %s2476_s7 }
 0x778   :  { %v964_v26 = vpop.permute.xlu0 %963 }
 0x779   :  { %v966_v27 = vpop.permute.xlu1 %965  ;;  %v969_v28 = vmul.f32 %v964_v26, %v912_v61 }
 0x77a   :  { %v970_v29 = vmul.f32 %v966_v27, %v927_v62 }
 0x77b   :  { %v973_v30 = vrot.slane %v969_v28, 2 }
 0x77c   :  { %v974_v31 = vrot.slane %v970_v29, 1 }
 0x77e   :  { %v975_v32 = vsel %vm413_vm5, %v974_v31, %v973_v30 }
 0x77f   :  { %976 = vrot.lane.b32.xlu0 %v975_v32, %s2476_s7 }
 0x7ab   :  { %v1002_v33 = vpop.permute.xlu1 %1001 }
 0x7ac   :  { %2142 = vmatmul.msk.f32.vlgmr.msra.gmra.mxu2 %vm434_vm12, %v1002_v33 }
 0x7ad   :  { %1589 = vmatpush.msra.mxu2 %v2710_v5 }
 0x7af   :  { %1590 = vmatpush.msra.mxu2 %v2712_v6 }
 0x7b1   :  { %1591 = vmatpush.msra.mxu2 %v2716_v7 }
 0x7b3   :  { %1592 = vmatpush.msra.mxu2 %v2721_v8 }
 0x7f1   :  { %v977_v39 = vpop.permute.xlu0 %976 }
 0x7f2   :  { %2141 = vmatmul.msk.f32.vlgmr.msra.gmra.mxu1 %vm434_vm12, %v977_v39  ;;  %2144 = vmatmul.msk.f32.vlgmr.msra.gmra.mxu3 %vm434_vm12, %v977_v39 }
 0x7f3   :  { %1473 = vmatpush.msra.mxu1 %v2854_v41  ;;  %1614 = vmatpush.msra.mxu3 %v2732_v16 }
 0x7f5   :  { %1474 = vmatpush.msra.mxu1 %v2861_v42  ;;  %1615 = vmatpush.msra.mxu3 %v2734_v17 }
 0x7f7   :  { %1475 = vmatpush.msra.mxu1 %v2648_v37  ;;  %1616 = vmatpush.msra.mxu3 %v2738_v18 }
 0x7f9   :  { %1476 = vmatpush.msra.mxu1 %v2653_v38  ;;  %1617 = vmatpush.msra.mxu3 %v2743_v19 }
 0x82f   :  { %v1022_v46 = vpop.f32.mrf.mxu2 }
 0x86f   :  { %v997_v43 = vpop.f32.mrf.mxu1 }
 0x870   :  { %v998_v45 = vadd.f32 %v2776_v25, %v997_v43 }
 0x872   :  { %v1025_v47 = vadd.f32 %v1022_v46, %v998_v45 }
 0x874   :  { %2251 = vtanh.f32 %v1025_v47  ;;  %v2143_v55 = vmul.f32 -1.442695, %v1025_v47 }
 0x875   :  { %v1080_v48 = vpop.f32.mrf.mxu3 }
 0x876   :  { %v1084_v49 = vrot.slane %v1080_v48, 5  ;;  %v1085_v3 = vrot.slane %v1080_v48, 6 }
 0x878   :  { %v1088_v51 = vadd.f32 %v1084_v49, %v2695_v36  ;;  %v1089_v50 = vadd.f32 %v1085_v3, %v2692_v20 }
 0x87a   :  { %v2252_v37 = vpop.eup %2251  ;;  %2253 = vtanh.f32 %v1088_v51  ;;  %v2145_v53 = vmul.f32 -1.442695, %v1088_v51  ;;  %v2146_v59 = vmul.f32 -1.442695, %v1089_v50 }
 0x87b   :  { %2255 = vtanh.f32 %v1089_v50  ;;  %1048 = vrot.lane.b32.xlu1 %v2252_v37, %s2475_s2  ;;  %v1132_v37 = vrot.slane %v2833_v22, 7 }
 0x87c   :  { %2257 = vpow2.f32 %v2145_v53 }
 0x880   :  { %v2254_v38 = vpop.eup %2253 }
 0x881   :  { %v2256_v52 = vpop.eup %2255  ;;  %1140 = vrot.lane.b32.xlu2 %v2254_v38, %s2475_s2 }
 0x882   :  { %1142 = vrot.lane.b32.xlu0 %v2256_v52, %s2475_s2  ;;  %v2258_v34 = vpop.eup %2257 }
 0x883   :  { %v1096_v54 = vadd.f32 1.0, %v2258_v34 }
 0x885   :  { %2259 = vrcp.f32 %v1096_v54  ;;  %v1109_v2 = vand.u32 2147483648, %v1096_v54  ;;  %vm1103_vm2 = vweird.f32 %v1096_v54  ;;  %v1107_v4 = vand.u32 2147483647, %v1096_v54 }
 0x886   :  { %2261 = vpow2.f32 %v2143_v55 }
 0x887   :  { %2263 = vpow2.f32 %v2146_v59  ;;  %v1110_v12 = vor.u32 1.1754944e-38, %v1109_v2  ;;  %vm1108_vm4 = vcmp.eq.f32.partialorder %v1107_v4, 8.507059e+37  ;;  %v1133_v59 = vrot.slane %v2835_v23, 7 }
 0x88b   :  { %v2260_v58 = vpop.eup %2259 }
 0x88c   :  { %v1099_v40 = vmul.f32 %v2260_v58, %v1096_v54  ;;  %v2262_v60 = vpop.eup %2261  ;;  %vm1104_vm1 = vweird.f32 %v2260_v58 }
 0x88d   :  { %v1029_v56 = vadd.f32 1.0, %v2262_v60  ;;  %v2264_v62 = vpop.eup %2263  ;;  %vm1105_vm3 = vmor %vm1103_vm2, %vm1104_vm1 }
 0x88e   :  { %v1100_v61 = vsub.f32 1.0, %v1099_v40  ;;  %v1097_v0 = vadd.f32 1.0, %v2264_v62 }
 0x88f   :  { %2265 = vrcp.f32 %v1029_v56  ;;  %v1041_v28 = vand.u32 2147483648, %v1029_v56  ;;  %vm1035_vm7 = vweird.f32 %v1029_v56  ;;  %v1039_v29 = vand.u32 2147483647, %v1029_v56 }
 0x890   :  { %v1101_v57 = vmul.f32 %v2260_v58, %v1100_v61  ;;  %2267 = vrcp.f32 %v1097_v0  ;;  %v1124_v46 = vand.u32 2147483648, %v1097_v0  ;;  %vm1118_vm11 = vweird.f32 %v1097_v0 }
 0x891   :  { %v1042_v32 = vor.u32 1.1754944e-38, %v1041_v28  ;;  %vm1040_vm9 = vcmp.eq.f32.partialorder %v1039_v29, 8.507059e+37  ;;  %v1122_v47 = vand.u32 2147483647, %v1097_v0 }
 0x892   :  { %v1102_v1 = vadd.f32 %v2260_v58, %v1101_v57  ;;  %v1125_v49 = vor.u32 1.1754944e-38, %v1124_v46 }
 0x893   :  { %vm1123_vm14 = vcmp.eq.f32.partialorder %v1122_v47, 8.507059e+37 }
 0x894   :  { %v1106_v11 = vsel %vm1105_vm3, %v2260_v58, %v1102_v1 }
 0x895   :  { %v2266_v10 = vpop.eup %2265  ;;  %v1111_v21 = vsel %vm1108_vm4, %v1110_v12, %v1106_v11  ;;  %v2905_v12 = vld [vmem:[%s3075_s6 + $0x8] sm:$0xff] }
 0x896   :  { %v1031_v13 = vmul.f32 %v2266_v10, %v1029_v56  ;;  %v2268_v63 = vpop.eup %2267  ;;  %vm1036_vm6 = vweird.f32 %v2266_v10  ;;  %v1136_v38 = vmul.f32 %v1132_v37, %v1111_v21 }
 0x897   :  { %v1114_v44 = vmul.f32 %v2268_v63, %v1097_v0  ;;  %vm1037_vm8 = vmor %vm1035_vm7, %vm1036_vm6  ;;  %vm1119_vm10 = vweird.f32 %v2268_v63 }
 0x898   :  { %v1032_v24 = vsub.f32 1.0, %v1031_v13  ;;  %vm1120_vm13 = vmor %vm1118_vm11, %vm1119_vm10  ;;  %v2912_v13 = vld [vmem:[%s3075_s6] sm:$0xff] }
 0x899   :  { %v1115_v26 = vsub.f32 1.0, %v1114_v44 }
 0x89a   :  { %v1033_v35 = vmul.f32 %v2266_v10, %v1032_v24 }
 0x89b   :  { %v1116_v30 = vmul.f32 %v2268_v63, %v1115_v26 }
 0x89c   :  { %v1034_v27 = vadd.f32 %v2266_v10, %v1033_v35 }
 0x89d   :  { %v1117_v43 = vadd.f32 %v2268_v63, %v1116_v30 }
 0x89e   :  { %v1038_v31 = vsel %vm1037_vm8, %v2266_v10, %v1034_v27 }
 0x89f   :  { %v1043_v39 = vsel %vm1040_vm9, %v1042_v32, %v1038_v31  ;;  %v1121_v48 = vsel %vm1120_vm13, %v2268_v63, %v1117_v43 }
 0x8a0   :  { %v1126_v51 = vsel %vm1123_vm14, %v1125_v49, %v1121_v48  ;;  %v1046_v54 = vmul.f32 %v1043_v39, %v2827_v9 }
 0x8a1   :  { %v1137_v40 = vmul.f32 %v1133_v59, %v1126_v51 }
 0x8db   :  { %v1141_v14 = vpop.permute.xlu2 %1140 }
 0x8dc   :  { %v1146_v15 = vmul.f32 %v1141_v14, %v1111_v21 }
 0x8de   :  { %1150 = vrot.lane.b32.xlu2 %v1146_v15, %s2476_s7 }
 0x8ed   :  { %v1049_v33 = vpop.permute.xlu1 %1048 }
 0x8ee   :  { %v1051_v45 = vmul.f32 %v1049_v33, %v1043_v39 }
 0x8f0   :  { %1053 = vrot.lane.b32.xlu1 %v1051_v45, %s2476_s7 }
 0x8f4   :  { %v1143_v3 = vpop.permute.xlu0 %1142 }
 0x8f5   :  { %v1147_v50 = vmul.f32 %v1143_v3, %v1126_v51 }
 0x8f7   :  { %1152 = vrot.lane.b32.xlu0 %v1147_v50, %s2476_s7 }
 0x938   :  { %v1151_v52 = vpop.permute.xlu2 %1150 }
 0x939   :  { %v2879_v53 = vadd.f32 %v1151_v52, %v1136_v38 }
 0x93b   :  { %2269 = vtanh.f32 %v2879_v53 }
 0x941   :  { %v2270_v34 = vpop.eup %2269 }
 0x942   :  { %1162 = vrot.lane.b32.xlu2 %v2270_v34, %s2475_s2 }
 0x962   :  { %v1054_v55 = vpop.permute.xlu1 %1053 }
 0x963   :  { %v2884_v58 = vadd.f32 %v1054_v55, %v1046_v54 }
 0x965   :  { %2271 = vtanh.f32 %v2884_v58 }
 0x969   :  { %v1153_v22 = vpop.permute.xlu0 %1152 }
 0x96a   :  { %v2888_v60 = vadd.f32 %v1153_v22, %v1137_v40 }
 0x96b   :  { %v2272_v61 = vpop.eup %2271 }
 0x96c   :  { %2273 = vtanh.f32 %v2888_v60  ;;  %1059 = vrot.lane.b32.xlu1 %v2272_v61, %s2475_s2 }
 0x972   :  { %v2274_v56 = vpop.eup %2273 }
 0x973   :  { %1164 = vrot.lane.b32.xlu0 %v2274_v56, %s2475_s2 }
 0x99c   :  { %v1163_v62 = vpop.permute.xlu2 %1162 }
 0x99d   :  { %v1168_v0 = vmul.f32 %v1163_v62, %v1111_v21 }
 0x99f   :  { %v1172_v2 = vrot.slane %v1168_v0, 3 }
 0x9de   :  { %v1060_v9 = vpop.permute.xlu1 %1059 }
 0x9df   :  { %v1062_v57 = vmul.f32 %v1060_v9, %v1043_v39 }
 0x9e1   :  { %1200 = vrot.lane.b32.xlu0 %v1062_v57, %s2476_s7 }
 0x9e5   :  { %v1165_v1 = vpop.permute.xlu0 %1164 }
 0x9e6   :  { %v1169_v23 = vmul.f32 %v1165_v1, %v1126_v51 }
 0x9e8   :  { %v1173_v4 = vrot.slane %v1169_v23, 2 }
 0x9ea   :  { %v1174_v10 = vsel %vm413_vm5, %v1173_v4, %v1172_v2 }
 0x9eb   :  { %1175 = vrot.lane.b32.xlu2 %v1174_v10, %s2476_s7 }
 0xa45   :  { %v1176_v11 = vpop.permute.xlu2 %1175 }
 0xa46   :  { %2147 = vmatmul.msk.f32.vlgmr.msrb.gmra.mxu0 %vm434_vm12, %v1176_v11  ;;  %2150 = vmatmul.msk.f32.vlgmr.msrb.gmra.mxu2 %vm434_vm12, %v1176_v11 }
 0xa47   :  { %1672 = vmatpush.msrb.mxu0 %v2854_v41  ;;  %1813 = vmatpush.msrb.mxu2 %v2732_v16 }
 0xa49   :  { %1673 = vmatpush.msrb.mxu0 %v2861_v42  ;;  %1814 = vmatpush.msrb.mxu2 %v2734_v17 }
 0xa4b   :  { %1674 = vmatpush.msrb.mxu0 %v2905_v12  ;;  %1815 = vmatpush.msrb.mxu2 %v2738_v18 }
 0xa4d   :  { %1675 = vmatpush.msrb.mxu0 %v2912_v13  ;;  %1816 = vmatpush.msrb.mxu2 %v2743_v19 }
 0xa53   :  { %v1201_v16 = vpop.permute.xlu0 %1200 }
 0xa54   :  { %2148 = vmatmul.msk.f32.vlgmr.msrb.gmra.mxu1 %vm434_vm12, %v1201_v16 }
 0xa55   :  { %1788 = vmatpush.msrb.mxu1 %v2710_v5 }
 0xa57   :  { %1789 = vmatpush.msrb.mxu1 %v2712_v6 }
 0xa59   :  { %1790 = vmatpush.msrb.mxu1 %v2716_v7 }
 0xa5b   :  { %1791 = vmatpush.msrb.mxu1 %v2721_v8 }
 0xac3   :  { %v1196_v63 = vpop.f32.mrf.mxu0 }
 0xac4   :  { %v1197_v19 = vadd.f32 %v2776_v25, %v1196_v63 }
 0xac9   :  { %v1279_v17 = vpop.f32.mrf.mxu2 }
 0xaca   :  { %v1283_v18 = vrot.slane %v1279_v17, 4  ;;  %v1284_v14 = vrot.slane %v1279_v17, 5 }
 0xacc   :  { %v1287_v21 = vadd.f32 %v1283_v18, %v2695_v36  ;;  %v1288_v15 = vadd.f32 %v1284_v14, %v2692_v20  ;;  %v1332_v14 = vrot.slane %v2888_v60, 7 }
 0xace   :  { %2275 = vtanh.f32 %v1287_v21  ;;  %v2152_v8 = vmul.f32 -1.442695, %v1288_v15  ;;  %v2151_v28 = vmul.f32 -1.442695, %v1287_v21 }
 0xacf   :  { %2277 = vtanh.f32 %v1288_v15 }
 0xad1   :  { %v1221_v24 = vpop.f32.mrf.mxu1 }
 0xad2   :  { %v1224_v5 = vadd.f32 %v1221_v24, %v1197_v19  ;;  %v1331_v24 = vrot.slane %v2879_v53, 7 }
 0xad4   :  { %v2276_v44 = vpop.eup %2275  ;;  %2279 = vtanh.f32 %v1224_v5  ;;  %v2149_v29 = vmul.f32 -1.442695, %v1224_v5 }
 0xad5   :  { %v2278_v6 = vpop.eup %2277  ;;  %1339 = vrot.lane.b32.xlu1 %v2276_v44, %s2475_s2  ;;  %2281 = vpow2.f32 %v2152_v8 }
 0xad6   :  { %1341 = vrot.lane.b32.xlu2 %v2278_v6, %s2475_s2 }
 0xada   :  { %v2280_v7 = vpop.eup %2279 }
 0xadb   :  { %1247 = vrot.lane.b32.xlu0 %v2280_v7, %s2475_s2  ;;  %v2282_v35 = vpop.eup %2281 }
 0xadc   :  { %v1296_v26 = vadd.f32 1.0, %v2282_v35 }
 0xade   :  { %2283 = vrcp.f32 %v1296_v26  ;;  %v1323_v45 = vand.u32 2147483648, %v1296_v26  ;;  %vm1317_vm0 = vweird.f32 %v1296_v26  ;;  %v1321_v46 = vand.u32 2147483647, %v1296_v26 }
 0xadf   :  { %2285 = vpow2.f32 %v2151_v28 }
 0xae0   :  { %2287 = vpow2.f32 %v2149_v29  ;;  %v1324_v49 = vor.u32 1.1754944e-38, %v1323_v45  ;;  %vm1322_vm2 = vcmp.eq.f32.partialorder %v1321_v46, 8.507059e+37  ;;  %v2385_v45 = vld [vmem:[#allocation2 + $0x8] sm:$0xff]  ;;  %v2386_v46 = vld [vmem:[#allocation2] sm:$0xff] }
 0xae4   :  { %v2284_v27 = vpop.eup %2283 }
 0xae5   :  { %v1313_v25 = vmul.f32 %v2284_v27, %v1296_v26  ;;  %v2286_v31 = vpop.eup %2285  ;;  %vm1318_vm15 = vweird.f32 %v2284_v27 }
 0xae6   :  { %v1295_v33 = vadd.f32 1.0, %v2286_v31  ;;  %v2288_v43 = vpop.eup %2287  ;;  %vm1319_vm1 = vmor %vm1317_vm0, %vm1318_vm15 }
 0xae7   :  { %v1314_v30 = vsub.f32 1.0, %v1313_v25  ;;  %v1228_v47 = vadd.f32 1.0, %v2288_v43  ;;  %v2384_v43 = vld [vmem:[#allocation2 + $0x10] sm:$0xff] }
 0xae8   :  { %2289 = vrcp.f32 %v1295_v33  ;;  %v1308_v22 = vand.u32 2147483648, %v1295_v33  ;;  %vm1302_vm4 = vweird.f32 %v1295_v33  ;;  %v1306_v61 = vand.u32 2147483647, %v1295_v33 }
 0xae9   :  { %v1315_v32 = vmul.f32 %v2284_v27, %v1314_v30  ;;  %2291 = vrcp.f32 %v1228_v47  ;;  %v1240_v23 = vand.u32 2147483648, %v1228_v47  ;;  %vm1234_vm9 = vweird.f32 %v1228_v47 }
 0xaea   :  { %v1309_v57 = vor.u32 1.1754944e-38, %v1308_v22  ;;  %vm1307_vm7 = vcmp.eq.f32.partialorder %v1306_v61, 8.507059e+37  ;;  %v1238_v4 = vand.u32 2147483647, %v1228_v47 }
 0xaeb   :  { %v1316_v39 = vadd.f32 %v2284_v27, %v1315_v32  ;;  %v1241_v11 = vor.u32 1.1754944e-38, %v1240_v23 }
 0xaec   :  { %vm1239_vm11 = vcmp.eq.f32.partialorder %v1238_v4, 8.507059e+37 }
 0xaed   :  { %v1320_v48 = vsel %vm1319_vm1, %v2284_v27, %v1316_v39  ;;  %v2383_v39 = vld [vmem:[#allocation2 + $0x18] sm:$0xff] }
 0xaee   :  { %v1325_v51 = vsel %vm1322_vm2, %v1324_v49, %v1320_v48  ;;  %v2290_v50 = vpop.eup %2289  ;;  %v2387_v48 = vld [vmem:[#allocation5 + $0x18] sm:$0xff]  ;;  %v2388_v49 = vld [vmem:[#allocation5 + $0x10] sm:$0xff] }
 0xaef   :  { %v1298_v38 = vmul.f32 %v2290_v50, %v1295_v33  ;;  %v2292_v52 = vpop.eup %2291  ;;  %vm1303_vm3 = vweird.f32 %v2290_v50  ;;  %v1336_v21 = vmul.f32 %v1332_v14, %v1325_v51 }
 0xaf0   :  { %v1230_v54 = vmul.f32 %v2292_v52, %v1228_v47  ;;  %vm1304_vm6 = vmor %vm1302_vm4, %vm1303_vm3  ;;  %vm1235_vm8 = vweird.f32 %v2292_v52 }
 0xaf1   :  { %v1299_v34 = vsub.f32 1.0, %v1298_v38  ;;  %vm1236_vm10 = vmor %vm1234_vm9, %vm1235_vm8 }
 0xaf2   :  { %v1231_v59 = vsub.f32 1.0, %v1230_v54 }
 0xaf3   :  { %v1300_v55 = vmul.f32 %v2290_v50, %v1299_v34 }
 0xaf4   :  { %v1232_v56 = vmul.f32 %v2292_v52, %v1231_v59 }
 0xaf5   :  { %v1301_v40 = vadd.f32 %v2290_v50, %v1300_v55 }
 0xaf6   :  { %v1233_v62 = vadd.f32 %v2292_v52, %v1232_v56 }
 0xaf7   :  { %v1305_v9 = vsel %vm1304_vm6, %v2290_v50, %v1301_v40 }
 0xaf8   :  { %v1310_v0 = vsel %vm1307_vm7, %v1309_v57, %v1305_v9  ;;  %v1237_v10 = vsel %vm1236_vm10, %v2292_v52, %v1233_v62 }
 0xaf9   :  { %v1242_v17 = vsel %vm1239_vm11, %v1241_v11, %v1237_v10  ;;  %v1335_v5 = vmul.f32 %v1331_v24, %v1310_v0 }
 0xafa   :  { %v1245_v7 = vmul.f32 %v1242_v17, %v2884_v58 }
 0xb30   :  { %v1342_v3 = vpop.permute.xlu2 %1341 }
 0xb31   :  { %v1346_v37 = vmul.f32 %v1342_v3, %v1325_v51  ;;  %v2389_v3 = vld [vmem:[#allocation5 + $0x8] sm:$0xff] }
 0xb33   :  { %1351 = vrot.lane.b32.xlu2 %v1346_v37, %s2476_s7 }
 0xb47   :  { %v1340_v1 = vpop.permute.xlu1 %1339 }
 0xb48   :  { %v1345_v2 = vmul.f32 %v1340_v1, %v1310_v0 }
 0xb4a   :  { %1349 = vrot.lane.b32.xlu1 %v1345_v2, %s2476_s7 }
 0xb4d   :  { %v1248_v16 = vpop.permute.xlu0 %1247 }
 0xb4e   :  { %v1250_v18 = vmul.f32 %v1248_v16, %v1242_v17 }
 0xb50   :  { %1252 = vrot.lane.b32.xlu0 %v1250_v18, %s2476_s7 }
 0xb8d   :  { %v1352_v15 = vpop.permute.xlu2 %1351 }
 0xb8e   :  { %v2931_v63 = vadd.f32 %v1352_v15, %v1336_v21 }
 0xb90   :  { %2293 = vtanh.f32 %v2931_v63 }
 0xb96   :  { %v2294_v19 = vpop.eup %2293 }
 0xb97   :  { %1363 = vrot.lane.b32.xlu2 %v2294_v19, %s2475_s2 }
 0xbbc   :  { %v1350_v44 = vpop.permute.xlu1 %1349 }
 0xbbd   :  { %v2936_v6 = vadd.f32 %v1350_v44, %v1335_v5 }
 0xbbf   :  { %2295 = vtanh.f32 %v2936_v6 }
 0xbc2   :  { %v1253_v60 = vpop.permute.xlu0 %1252 }
 0xbc3   :  { %v2940_v8 = vadd.f32 %v1253_v60, %v1245_v7 }
 0xbc5   :  { %v2296_v35 = vpop.eup %2295  ;;  %2297 = vtanh.f32 %v2940_v8 }
 0xbc6   :  { %1361 = vrot.lane.b32.xlu1 %v2296_v35, %s2475_s2 }
 0xbcb   :  { %v2298_v26 = vpop.eup %2297 }
 0xbcc   :  { %1258 = vrot.lane.b32.xlu0 %v2298_v26, %s2475_s2 }
 0xbf1   :  { %v1364_v53 = vpop.permute.xlu2 %1363 }
 0xbf2   :  { %v1368_v27 = vmul.f32 %v1364_v53, %v1325_v51  ;;  %v2390_v51 = vld [vmem:[#allocation5] sm:$0xff] }
 0xbf4   :  { %v1372_v29 = vrot.slane %v1368_v27, 3 }
 0xc38   :  { %v1362_v28 = vpop.permute.xlu1 %1361 }
 0xc39   :  { %v1367_v25 = vmul.f32 %v1362_v28, %v1310_v0 }
 0xc3b   :  { %v1371_v30 = vrot.slane %v1367_v25, 4 }
 0xc3d   :  { %v1373_v31 = vsel %vm413_vm5, %v1372_v29, %v1371_v30 }
 0xc3e   :  { %1374 = vrot.lane.b32.xlu1 %v1373_v31, %s2476_s7  ;;  %v1259_v58 = vpop.permute.xlu0 %1258 }
 0xc3f   :  { %v1261_v32 = vmul.f32 %v1259_v58, %v1242_v17 }
 0xc41   :  { %1399 = vrot.lane.b32.xlu2 %v1261_v32, %s2476_s7 }
 0xc9b   :  { %v1400_v33 = vpop.permute.xlu2 %1399 }
 0xc9c   :  { %2154 = vmatmul.msk.f32.vlgmr.msra.gmra.mxu0 %vm434_vm12, %v1400_v33 }
 0xc9d   :  { %1987 = vmatpush.msra.mxu0 %v2383_v39 }
 0xc9f   :  { %1988 = vmatpush.msra.mxu0 %v2384_v43 }
 0xca1   :  { %1989 = vmatpush.msra.mxu0 %v2385_v45 }
 0xca3   :  { %1990 = vmatpush.msra.mxu0 %v2386_v46 }
 0xcb0   :  { %v1375_v47 = vpop.permute.xlu1 %1374 }
 0xcb1   :  { %2153 = vmatmul.msk.f32.vlgmr.msrb.gmra.mxu3 %vm434_vm12, %v1375_v47  ;;  %2156 = vmatmul.msk.f32.vlgmr.msra.gmra.mxu1 %vm434_vm12, %v1375_v47 }
 0xcb2   :  { %1871 = vmatpush.msrb.mxu3 %v2854_v41  ;;  %2012 = vmatpush.msra.mxu1 %v2387_v48 }
 0xcb4   :  { %1872 = vmatpush.msrb.mxu3 %v2861_v42  ;;  %2013 = vmatpush.msra.mxu1 %v2388_v49 }
 0xcb6   :  { %1873 = vmatpush.msrb.mxu3 %v2905_v12  ;;  %2014 = vmatpush.msra.mxu1 %v2389_v3  ;;  %v2960_v12 = vld [vmem:[%s3079_s10] ss:$0 sm:$0xff] }
 0xcb8   :  { %1874 = vmatpush.msrb.mxu3 %v2912_v13  ;;  %2015 = vmatpush.msra.mxu1 %v2390_v51 }
 0xd19   :  { %v1420_v13 = vpop.f32.mrf.mxu0 }
 0xd2e   :  { %v1478_v50 = vpop.f32.mrf.mxu1 }
 0xd2f   :  { %v1482_v37 = vrot.slane %v1478_v50, 3  ;;  %v1483_v38 = vrot.slane %v1478_v50, 4 }
 0xd31   :  { %v1486_v52 = vadd.f32 %v1482_v37, %v2695_v36  ;;  %v1487_v41 = vadd.f32 %v1483_v38, %v2692_v20 }
 0xd33   :  { %2299 = vtanh.f32 %v1486_v52  ;;  %v2157_v9 = vmul.f32 -1.442695, %v1486_v52  ;;  %v2158_v57 = vmul.f32 -1.442695, %v1487_v41  ;;  %v1530_v52 = vrot.slane %v2936_v6, 7 }
 0xd34   :  { %2301 = vtanh.f32 %v1487_v41  ;;  %v1395_v42 = vpop.f32.mrf.mxu3  ;;  %v1531_v41 = vrot.slane %v2931_v63, 7 }
 0xd35   :  { %v1396_v34 = vadd.f32 %v2960_v12, %v1395_v42 }
 0xd37   :  { %v1423_v54 = vadd.f32 %v1420_v13, %v1396_v34 }
 0xd39   :  { %v2300_v55 = vpop.eup %2299  ;;  %2303 = vtanh.f32 %v1423_v54  ;;  %v2155_v22 = vmul.f32 -1.442695, %v1423_v54 }
 0xd3a   :  { %v2302_v59 = vpop.eup %2301  ;;  %1538 = vrot.lane.b32.xlu0 %v2300_v55, %s2475_s2 }
 0xd3b   :  { %1540 = vrot.lane.b32.xlu1 %v2302_v59, %s2475_s2  ;;  %2305 = vpow2.f32 %v2155_v22 }
 0xd3f   :  { %v2304_v40 = vpop.eup %2303 }
 0xd40   :  { %1446 = vrot.lane.b32.xlu2 %v2304_v40, %s2475_s2 }
 0xd41   :  { %v2306_v61 = vpop.eup %2305 }
 0xd42   :  { %v1427_v56 = vadd.f32 1.0, %v2306_v61 }
 0xd44   :  { %2307 = vrcp.f32 %v1427_v56  ;;  %v1439_v17 = vand.u32 2147483648, %v1427_v56  ;;  %vm1433_vm14 = vweird.f32 %v1427_v56  ;;  %v1437_v18 = vand.u32 2147483647, %v1427_v56 }
 0xd45   :  { %2309 = vpow2.f32 %v2157_v9 }
 0xd46   :  { %2311 = vpow2.f32 %v2158_v57  ;;  %v1440_v19 = vor.u32 1.1754944e-38, %v1439_v17  ;;  %vm1438_vm0 = vcmp.eq.f32.partialorder %v1437_v18, 8.507059e+37 }
 0xd4a   :  { %v2308_v62 = vpop.eup %2307 }
 0xd4b   :  { %v1429_v0 = vmul.f32 %v2308_v62, %v1427_v56  ;;  %v2310_v1 = vpop.eup %2309  ;;  %vm1434_vm13 = vweird.f32 %v2308_v62 }
 0xd4c   :  { %v2312_v23 = vpop.eup %2311  ;;  %v1494_v4 = vadd.f32 1.0, %v2310_v1  ;;  %vm1435_vm15 = vmor %vm1433_vm14, %vm1434_vm13 }
 0xd4d   :  { %v1430_v2 = vsub.f32 1.0, %v1429_v0  ;;  %v1495_v10 = vadd.f32 1.0, %v2312_v23 }
 0xd4e   :  { %2313 = vrcp.f32 %v1494_v4  ;;  %v1507_v29 = vand.u32 2147483648, %v1494_v4  ;;  %vm1501_vm3 = vweird.f32 %v1494_v4  ;;  %v1505_v31 = vand.u32 2147483647, %v1494_v4 }
 0xd4f   :  { %v1431_v11 = vmul.f32 %v2308_v62, %v1430_v2  ;;  %2315 = vrcp.f32 %v1495_v10  ;;  %v1522_v30 = vand.u32 2147483648, %v1495_v10  ;;  %vm1516_vm4 = vweird.f32 %v1495_v10 }
 0xd50   :  { %v1520_v58 = vand.u32 2147483647, %v1495_v10  ;;  %v1508_v39 = vor.u32 1.1754944e-38, %v1507_v29  ;;  %vm1506_vm8 = vcmp.eq.f32.partialorder %v1505_v31, 8.507059e+37 }
 0xd51   :  { %v1432_v16 = vadd.f32 %v2308_v62, %v1431_v11  ;;  %v1523_v43 = vor.u32 1.1754944e-38, %v1522_v30 }
 0xd52   :  { %vm1521_vm9 = vcmp.eq.f32.partialorder %v1520_v58, 8.507059e+37 }
 0xd53   :  { %v1436_v15 = vsel %vm1435_vm15, %v2308_v62, %v1432_v16 }
 0xd54   :  { %v2314_v14 = vpop.eup %2313  ;;  %v1441_v44 = vsel %vm1438_vm0, %v1440_v19, %v1436_v15 }
 0xd55   :  { %v2316_v21 = vpop.eup %2315  ;;  %v1497_v24 = vmul.f32 %v2314_v14, %v1494_v4  ;;  %vm1502_vm1 = vweird.f32 %v2314_v14  ;;  %v1444_v51 = vmul.f32 %v1441_v44, %v2940_v8 }
 0xd56   :  { %v1512_v7 = vmul.f32 %v2316_v21, %v1495_v10  ;;  %vm1517_vm2 = vweird.f32 %v2316_v21  ;;  %vm1503_vm6 = vmor %vm1501_vm3, %vm1502_vm1 }
 0xd57   :  { %v1498_v35 = vsub.f32 1.0, %v1497_v24  ;;  %vm1518_vm7 = vmor %vm1516_vm4, %vm1517_vm2 }
 0xd58   :  { %v1513_v26 = vsub.f32 1.0, %v1512_v7 }
 0xd59   :  { %v1499_v53 = vmul.f32 %v2314_v14, %v1498_v35 }
 0xd5a   :  { %v1514_v27 = vmul.f32 %v2316_v21, %v1513_v26 }
 0xd5b   :  { %v1500_v28 = vadd.f32 %v2314_v14, %v1499_v53 }
 0xd5c   :  { %v1515_v25 = vadd.f32 %v2316_v21, %v1514_v27 }
 0xd5d   :  { %v1504_v32 = vsel %vm1503_vm6, %v2314_v14, %v1500_v28 }
 0xd5e   :  { %v1519_v33 = vsel %vm1518_vm7, %v2316_v21, %v1515_v25  ;;  %v1509_v46 = vsel %vm1506_vm8, %v1508_v39, %v1504_v32 }
 0xd5f   :  { %v1524_v48 = vsel %vm1521_vm9, %v1523_v43, %v1519_v33  ;;  %v1534_v42 = vmul.f32 %v1530_v52, %v1509_v46 }
 0xd60   :  { %v1535_v34 = vmul.f32 %v1531_v41, %v1524_v48 }
 0xd9a   :  { %v1447_v5 = vpop.permute.xlu2 %1446 }
 0xd9b   :  { %v1449_v60 = vmul.f32 %v1447_v5, %v1441_v44 }
 0xd9d   :  { %1451 = vrot.lane.b32.xlu2 %v1449_v60, %s2476_s7 }
 0xdac   :  { %v1539_v45 = vpop.permute.xlu0 %1538 }
 0xdad   :  { %v1541_v47 = vpop.permute.xlu1 %1540  ;;  %v1544_v49 = vmul.f32 %v1539_v45, %v1509_v46 }
 0xdae   :  { %v1545_v3 = vmul.f32 %v1541_v47, %v1524_v48 }
 0xdaf   :  { %1548 = vrot.lane.b32.xlu0 %v1544_v49, %s2476_s7 }
 0xdb0   :  { %1550 = vrot.lane.b32.xlu1 %v1545_v3, %s2476_s7 }
 0xdf7   :  { %v1452_v50 = vpop.permute.xlu2 %1451 }
 0xdf8   :  { %v2970_v37 = vadd.f32 %v1452_v50, %v1444_v51 }
 0xdfa   :  { %2317 = vtanh.f32 %v2970_v37 }
 0xe00   :  { %v2318_v38 = vpop.eup %2317 }
 0xe01   :  { %1457 = vrot.lane.b32.xlu2 %v2318_v38, %s2475_s2 }
 0xe21   :  { %v1549_v13 = vpop.permute.xlu0 %1548 }
 0xe22   :  { %v1551_v54 = vpop.permute.xlu1 %1550  ;;  %v2976_v55 = vadd.f32 %v1549_v13, %v1534_v42 }
 0xe23   :  { %v2978_v59 = vadd.f32 %v1551_v54, %v1535_v34 }
 0xe24   :  { %2319 = vtanh.f32 %v2976_v55 }
 0xe25   :  { %2321 = vtanh.f32 %v2978_v59 }
 0xe2a   :  { %v2320_v8 = vpop.eup %2319 }
 0xe2b   :  { %v2322_v40 = vpop.eup %2321  ;;  %1560 = vrot.lane.b32.xlu0 %v2320_v8, %s2475_s2 }
 0xe2c   :  { %1562 = vrot.lane.b32.xlu1 %v2322_v40, %s2475_s2 }
 0xe5b   :  { %v1458_v6 = vpop.permute.xlu2 %1457 }
 0xe5c   :  { %v1460_v63 = vmul.f32 %v1458_v6, %v1441_v44 }
 0xe5e   :  { %1598 = vrot.lane.b32.xlu1 %v1460_v63, %s2476_s7 }
 0xe9d   :  { %v1561_v22 = vpop.permute.xlu0 %1560 }
 0xe9e   :  { %v1563_v61 = vpop.permute.xlu1 %1562  ;;  %v1566_v56 = vmul.f32 %v1561_v22, %v1509_v46 }
 0xe9f   :  { %v1567_v9 = vmul.f32 %v1563_v61, %v1524_v48 }
 0xea0   :  { %v1570_v57 = vrot.slane %v1566_v56, 5 }
 0xea1   :  { %v1571_v62 = vrot.slane %v1567_v9, 4 }
 0xea3   :  { %v1572_v0 = vsel %vm413_vm5, %v1571_v62, %v1570_v57 }
 0xea4   :  { %1573 = vrot.lane.b32.xlu0 %v1572_v0, %s2476_s7 }
 0xed0   :  { %v1599_v1 = vpop.permute.xlu1 %1598 }
 0xed1   :  { %2160 = vmatmul.msk.f32.vlgmr.msra.gmra.mxu3 %vm434_vm12, %v1599_v1 }
 0xf16   :  { %v1574_v23 = vpop.permute.xlu0 %1573 }
 0xf17   :  { %2159 = vmatmul.msk.f32.vlgmr.msra.gmra.mxu2 %vm434_vm12, %v1574_v23  ;;  %2162 = vmatmul.msk.f32.vlgmr.msrb.gmra.mxu0 %vm434_vm12, %v1574_v23  ;;  %v1729_v23 = vrot.slane %v2976_v55, 7 }
 0xf54   :  { %v1619_v14 = vpop.f32.mrf.mxu3 }
 0xf94   :  { %v1677_v2 = vpop.f32.mrf.mxu0 }
 0xf95   :  { %v1681_v4 = vrot.slane %v1677_v2, 2  ;;  %v1682_v10 = vrot.slane %v1677_v2, 3 }
 0xf97   :  { %v1685_v11 = vadd.f32 %v1681_v4, %v2695_v36  ;;  %v1686_v16 = vadd.f32 %v1682_v10, %v2692_v20 }
 0xf99   :  { %2323 = vtanh.f32 %v1685_v11  ;;  %v2163_v5 = vmul.f32 -1.442695, %v1685_v11  ;;  %v2164_v35 = vmul.f32 -1.442695, %v1686_v16 }
 0xf9a   :  { %2325 = vtanh.f32 %v1686_v16  ;;  %v1594_v17 = vpop.f32.mrf.mxu2  ;;  %v1730_v16 = vrot.slane %v2978_v59, 7 }
 0xf9b   :  { %v1595_v18 = vadd.f32 %v2960_v12, %v1594_v17 }
 0xf9d   :  { %v1622_v21 = vadd.f32 %v1619_v14, %v1595_v18 }
 0xf9f   :  { %v2324_v15 = vpop.eup %2323  ;;  %2327 = vtanh.f32 %v1622_v21  ;;  %v2161_v53 = vmul.f32 -1.442695, %v1622_v21 }
 0xfa0   :  { %v2326_v19 = vpop.eup %2325  ;;  %1737 = vrot.lane.b32.xlu2 %v2324_v15, %s2475_s2  ;;  %2329 = vpow2.f32 %v2163_v5 }
 0xfa1   :  { %1739 = vrot.lane.b32.xlu0 %v2326_v19, %s2475_s2 }
 0xfa5   :  { %v2328_v24 = vpop.eup %2327 }
 0xfa6   :  { %1645 = vrot.lane.b32.xlu1 %v2328_v24, %s2475_s2  ;;  %v2330_v44 = vpop.eup %2329 }
 0xfa7   :  { %v1693_v7 = vadd.f32 1.0, %v2330_v44 }
 0xfa9   :  { %2331 = vrcp.f32 %v1693_v7  ;;  %v1706_v31 = vand.u32 2147483648, %v1693_v7  ;;  %vm1700_vm11 = vweird.f32 %v1693_v7  ;;  %v1704_v32 = vand.u32 2147483647, %v1693_v7 }
 0xfaa   :  { %2333 = vpow2.f32 %v2164_v35 }
 0xfab   :  { %2335 = vpow2.f32 %v2161_v53  ;;  %v1707_v43 = vor.u32 1.1754944e-38, %v1706_v31  ;;  %vm1705_vm14 = vcmp.eq.f32.partialorder %v1704_v32, 8.507059e+37 }
 0xfaf   :  { %v2332_v60 = vpop.eup %2331 }
 0xfb0   :  { %v1696_v26 = vmul.f32 %v2332_v60, %v1693_v7  ;;  %v2334_v25 = vpop.eup %2333  ;;  %vm1701_vm10 = vweird.f32 %v2332_v60 }
 0xfb1   :  { %v1694_v29 = vadd.f32 1.0, %v2334_v25  ;;  %v2336_v58 = vpop.eup %2335  ;;  %vm1702_vm13 = vmor %vm1700_vm11, %vm1701_vm10 }
 0xfb2   :  { %v1697_v27 = vsub.f32 1.0, %v1696_v26  ;;  %v1626_v39 = vadd.f32 1.0, %v2336_v58 }
 0xfb3   :  { %2337 = vrcp.f32 %v1694_v29  ;;  %v1721_v42 = vand.u32 2147483648, %v1694_v29  ;;  %vm1715_vm0 = vweird.f32 %v1694_v29  ;;  %v1719_v13 = vand.u32 2147483647, %v1694_v29 }
 0xfb4   :  { %v1698_v28 = vmul.f32 %v2332_v60, %v1697_v27  ;;  %2339 = vrcp.f32 %v1626_v39  ;;  %v1638_v6 = vand.u32 2147483648, %v1626_v39  ;;  %vm1632_vm4 = vweird.f32 %v1626_v39 }
 0xfb5   :  { %v1722_v8 = vor.u32 1.1754944e-38, %v1721_v42  ;;  %vm1720_vm3 = vcmp.eq.f32.partialorder %v1719_v13, 8.507059e+37  ;;  %v1636_v61 = vand.u32 2147483647, %v1626_v39 }
 0xfb6   :  { %v1699_v30 = vadd.f32 %v2332_v60, %v1698_v28  ;;  %v1639_v57 = vor.u32 1.1754944e-38, %v1638_v6 }
 0xfb7   :  { %vm1637_vm7 = vcmp.eq.f32.partialorder %v1636_v61, 8.507059e+37 }
 0xfb8   :  { %v1703_v33 = vsel %vm1702_vm13, %v2332_v60, %v1699_v30 }
 0xfb9   :  { %v1708_v45 = vsel %vm1705_vm14, %v1707_v43, %v1703_v33  ;;  %v2338_v48 = vpop.eup %2337 }
 0xfba   :  { %v1711_v49 = vmul.f32 %v2338_v48, %v1694_v29  ;;  %v2340_v3 = vpop.eup %2339  ;;  %vm1716_vm15 = vweird.f32 %v2338_v48  ;;  %v1733_v2 = vmul.f32 %v1729_v23, %v1708_v45 }
 0xfbb   :  { %v1628_v50 = vmul.f32 %v2340_v3, %v1626_v39  ;;  %vm1717_vm1 = vmor %vm1715_vm0, %vm1716_vm15  ;;  %vm1633_vm2 = vweird.f32 %v2340_v3 }
 0xfbc   :  { %v1712_v51 = vsub.f32 1.0, %v1711_v49  ;;  %vm1634_vm6 = vmor %vm1632_vm4, %vm1633_vm2 }
 0xfbd   :  { %v1629_v52 = vsub.f32 1.0, %v1628_v50 }
 0xfbe   :  { %v1713_v38 = vmul.f32 %v2338_v48, %v1712_v51 }
 0xfbf   :  { %v1630_v34 = vmul.f32 %v2340_v3, %v1629_v52 }
 0xfc0   :  { %v1714_v41 = vadd.f32 %v2338_v48, %v1713_v38 }
 0xfc1   :  { %v1631_v40 = vadd.f32 %v2340_v3, %v1630_v34 }
 0xfc2   :  { %v1718_v54 = vsel %vm1717_vm1, %v2338_v48, %v1714_v41 }
 0xfc3   :  { %v1723_v22 = vsel %vm1720_vm3, %v1722_v8, %v1718_v54  ;;  %v1635_v9 = vsel %vm1634_vm6, %v2340_v3, %v1631_v40 }
 0xfc4   :  { %v1640_v0 = vsel %vm1637_vm7, %v1639_v57, %v1635_v9  ;;  %v1734_v17 = vmul.f32 %v1730_v16, %v1723_v22 }
 0xfc5   :  { %v1643_v21 = vmul.f32 %v1640_v0, %v2970_v37 }
 0xffa   :  { %v1738_v46 = vpop.permute.xlu2 %1737 }
 0xffb   :  { %v1743_v47 = vmul.f32 %v1738_v46, %v1708_v45 }
 0xffd   :  { %1747 = vrot.lane.b32.xlu2 %v1743_v47, %s2476_s7 }
0x1013   :  { %v1740_v63 = vpop.permute.xlu0 %1739 }
0x1014   :  { %v1744_v56 = vmul.f32 %v1740_v63, %v1723_v22 }
0x1016   :  { %1749 = vrot.lane.b32.xlu0 %v1744_v56, %s2476_s7 }
0x1018   :  { %v1646_v62 = vpop.permute.xlu1 %1645 }
0x1019   :  { %v1648_v1 = vmul.f32 %v1646_v62, %v1640_v0 }
0x101b   :  { %1650 = vrot.lane.b32.xlu1 %v1648_v1, %s2476_s7 }
0x1057   :  { %v1748_v4 = vpop.permute.xlu2 %1747 }
0x1058   :  { %v3000_v10 = vadd.f32 %v1748_v4, %v1733_v2 }
0x105a   :  { %2341 = vtanh.f32 %v3000_v10 }
0x1060   :  { %v2342_v11 = vpop.eup %2341 }
0x1061   :  { %1759 = vrot.lane.b32.xlu2 %v2342_v11, %s2475_s2 }
0x1088   :  { %v1750_v18 = vpop.permute.xlu0 %1749 }
0x1089   :  { %v3005_v14 = vadd.f32 %v1750_v18, %v1734_v17 }
0x108b   :  { %2343 = vtanh.f32 %v3005_v14 }
0x108d   :  { %v1651_v55 = vpop.permute.xlu1 %1650 }
0x108e   :  { %v3009_v15 = vadd.f32 %v1651_v55, %v1643_v21 }
0x1090   :  { %2345 = vtanh.f32 %v3009_v15 }
0x1091   :  { %v2344_v19 = vpop.eup %2343 }
0x1092   :  { %1761 = vrot.lane.b32.xlu0 %v2344_v19, %s2475_s2 }
0x1096   :  { %v2346_v24 = vpop.eup %2345 }
0x1097   :  { %1656 = vrot.lane.b32.xlu1 %v2346_v24, %s2475_s2 }
0x10bb   :  { %v1760_v59 = vpop.permute.xlu2 %1759 }
0x10bc   :  { %v1765_v5 = vmul.f32 %v1760_v59, %v1708_v45 }
0x10be   :  { %v1769_v60 = vrot.slane %v1765_v5, 6 }
0x1104   :  { %v1762_v44 = vpop.permute.xlu0 %1761 }
0x1105   :  { %v1766_v7 = vmul.f32 %v1762_v44, %v1723_v22 }
0x1107   :  { %v1770_v35 = vrot.slane %v1766_v7, 5 }
0x1109   :  { %v1657_v26 = vpop.permute.xlu1 %1656  ;;  %v1771_v37 = vsel %vm413_vm5, %v1770_v35, %v1769_v60 }
0x110a   :  { %v1659_v53 = vmul.f32 %v1657_v26, %v1640_v0  ;;  %1772 = vrot.lane.b32.xlu2 %v1771_v37, %s2476_s7 }
0x110c   :  { %1797 = vrot.lane.b32.xlu0 %v1659_v53, %s2476_s7  ;;  %v1929_v53 = vrot.slane %v3005_v14, 7 }
0x1164   :  { %v1773_v27 = vpop.permute.xlu2 %1772 }
0x1165   :  { %2165 = vmatmul.msk.f32.vlgmr.msrb.gmra.mxu1 %vm434_vm12, %v1773_v27  ;;  %2168 = vmatmul.msk.f32.vlgmr.msrb.gmra.mxu3 %vm434_vm12, %v1773_v27 }
0x117e   :  { %v1798_v28 = vpop.permute.xlu0 %1797 }
0x117f   :  { %2166 = vmatmul.msk.f32.vlgmr.msrb.gmra.mxu2 %vm434_vm12, %v1798_v28 }
0x11e2   :  { %v1793_v39 = vpop.f32.mrf.mxu1 }
0x11e3   :  { %v1794_v43 = vadd.f32 %v2960_v12, %v1793_v39 }
0x11e8   :  { %v1876_v25 = vpop.f32.mrf.mxu3 }
0x11e9   :  { %v1880_v29 = vrot.slane %v1876_v25, 1  ;;  %v1881_v30 = vrot.slane %v1876_v25, 2 }
0x11eb   :  { %v1884_v31 = vadd.f32 %v1880_v29, %v2695_v36  ;;  %v1885_v58 = vadd.f32 %v1881_v30, %v2692_v20  ;;  %v1928_v30 = vrot.slane %v3000_v10, 7 }
0x11ed   :  { %2347 = vtanh.f32 %v1884_v31  ;;  %v2170_v36 = vmul.f32 -1.442695, %v1885_v58  ;;  %v2169_v3 = vmul.f32 -1.442695, %v1884_v31 }
0x11ee   :  { %2349 = vtanh.f32 %v1885_v58 }
0x11f3   :  { %v2348_v32 = vpop.eup %2347 }
0x11f4   :  { %v2350_v33 = vpop.eup %2349  ;;  %1936 = vrot.lane.b32.xlu1 %v2348_v32, %s2475_s2 }
0x11f5   :  { %1938 = vrot.lane.b32.xlu2 %v2350_v33, %s2475_s2 }
0x1202   :  { %v1818_v45 = vpop.f32.mrf.mxu2 }
0x1203   :  { %v1821_v46 = vadd.f32 %v1818_v45, %v1794_v43 }
0x1205   :  { %2351 = vtanh.f32 %v1821_v46  ;;  %v2167_v61 = vmul.f32 -1.442695, %v1821_v46 }
0x1206   :  { %2353 = vpow2.f32 %v2170_v36 }
0x120b   :  { %v2352_v47 = vpop.eup %2351 }
0x120c   :  { %1844 = vrot.lane.b32.xlu0 %v2352_v47, %s2475_s2  ;;  %v2354_v20 = vpop.eup %2353 }
0x120d   :  { %v1893_v48 = vadd.f32 1.0, %v2354_v20 }
0x120f   :  { %2355 = vrcp.f32 %v1893_v48  ;;  %v1920_v34 = vand.u32 2147483648, %v1893_v48  ;;  %vm1914_vm9 = vweird.f32 %v1893_v48  ;;  %v1918_v13 = vand.u32 2147483647, %v1893_v48 }
0x1210   :  { %2357 = vpow2.f32 %v2169_v3 }
0x1211   :  { %v1921_v8 = vor.u32 1.1754944e-38, %v1920_v34  ;;  %vm1919_vm11 = vcmp.eq.f32.partialorder %v1918_v13, 8.507059e+37 }
0x1215   :  { %v2356_v49 = vpop.eup %2355 }
0x1216   :  { %v1910_v51 = vmul.f32 %v2356_v49, %v1893_v48  ;;  %v2358_v38 = vpop.eup %2357  ;;  %vm1915_vm8 = vweird.f32 %v2356_v49 }
0x1217   :  { %v1892_v41 = vadd.f32 1.0, %v2358_v38  ;;  %vm1916_vm10 = vmor %vm1914_vm9, %vm1915_vm8  ;;  %vm2091_vm9 = vcmask 58368  }
0x1218   :  { %v1911_v50 = vsub.f32 1.0, %v1910_v51 }
0x1219   :  { %2359 = vrcp.f32 %v1892_v41  ;;  %v1905_v23 = vand.u32 2147483648, %v1892_v41  ;;  %vm1899_vm14 = vweird.f32 %v1892_v41  ;;  %v1903_v2 = vand.u32 2147483647, %v1892_v41 }
0x121a   :  { %v1912_v52 = vmul.f32 %v2356_v49, %v1911_v50  ;;  %2361 = vpow2.f32 %v2167_v61 }
0x121b   :  { %v1906_v11 = vor.u32 1.1754944e-38, %v1905_v23  ;;  %vm1904_vm0 = vcmp.eq.f32.partialorder %v1903_v2, 8.507059e+37 }
0x121c   :  { %v1913_v42 = vadd.f32 %v2356_v49, %v1912_v52 }
0x121e   :  { %v1917_v54 = vsel %vm1916_vm10, %v2356_v49, %v1913_v42 }
0x121f   :  { %v3026_v6 = vsel %vm1919_vm11, %v1921_v8, %v1917_v54  ;;  %v2360_v63 = vpop.eup %2359 }
0x1220   :  { %v1895_v56 = vmul.f32 %v2360_v63, %v1892_v41  ;;  %v2362_v57 = vpop.eup %2361  ;;  %vm1900_vm13 = vweird.f32 %v2360_v63  ;;  %v1933_v27 = vmul.f32 %v1929_v53, %v3026_v6 }
0x1221   :  { %v1825_v0 = vadd.f32 1.0, %v2362_v57  ;;  %vm1901_vm15 = vmor %vm1899_vm14, %vm1900_vm13 }
0x1222   :  { %v1896_v9 = vsub.f32 1.0, %v1895_v56 }
0x1223   :  { %2363 = vrcp.f32 %v1825_v0  ;;  %v1837_v5 = vand.u32 2147483648, %v1825_v0  ;;  %vm1831_vm2 = vweird.f32 %v1825_v0  ;;  %v1835_v44 = vand.u32 2147483647, %v1825_v0 }
0x1224   :  { %v1897_v62 = vmul.f32 %v2360_v63, %v1896_v9 }
0x1225   :  { %v1838_v60 = vor.u32 1.1754944e-38, %v1837_v5  ;;  %vm1836_vm4 = vcmp.eq.f32.partialorder %v1835_v44, 8.507059e+37 }
0x1226   :  { %v1898_v1 = vadd.f32 %v2360_v63, %v1897_v62 }
0x1228   :  { %v1902_v4 = vsel %vm1901_vm15, %v2360_v63, %v1898_v1 }
0x1229   :  { %v1907_v17 = vsel %vm1904_vm0, %v1906_v11, %v1902_v4  ;;  %v2364_v21 = vpop.eup %2363 }
0x122a   :  { %v1827_v55 = vmul.f32 %v2364_v21, %v1825_v0  ;;  %vm1832_vm1 = vweird.f32 %v2364_v21  ;;  %v1932_v31 = vmul.f32 %v1928_v30, %v1907_v17 }
0x122b   :  { %vm1833_vm3 = vmor %vm1831_vm2, %vm1832_vm1 }
0x122c   :  { %v1828_v19 = vsub.f32 1.0, %v1827_v55 }
0x122e   :  { %v1829_v24 = vmul.f32 %v2364_v21, %v1828_v19 }
0x1230   :  { %v1830_v59 = vadd.f32 %v2364_v21, %v1829_v24 }
0x1232   :  { %v1834_v7 = vsel %vm1833_vm3, %v2364_v21, %v1830_v59  ;;  %v2058_v21 = vld [vmem:[%s3080_s11] sm:$0xff] }
0x1233   :  { %v1839_v26 = vsel %vm1836_vm4, %v1838_v60, %v1834_v7  ;;  %v2186_v59 = vld [vmem:[%s3081_s12] ss:$0 sm:$0xff] }
0x1234   :  { %v1842_v39 = vmul.f32 %v1839_v26, %v3009_v15 }
0x124f   :  { %v1939_v40 = vpop.permute.xlu2 %1938 }
0x1250   :  { %v1943_v22 = vmul.f32 %v1939_v40, %v3026_v6 }
0x1252   :  { %1948 = vrot.lane.b32.xlu2 %v1943_v22, %s2476_s7 }
0x1266   :  { %v1937_v16 = vpop.permute.xlu1 %1936 }
0x1267   :  { %v1942_v18 = vmul.f32 %v1937_v16, %v1907_v17  ;;  %v2061_v16 = vld [vmem:[%s3080_s11 + $0x18] sm:$0xff] }
0x1268   :  { %2083 = vmatpush.msra.mxu2 %v2061_v16 }
0x1269   :  { %1946 = vrot.lane.b32.xlu1 %v1942_v18, %s2476_s7  ;;  %v2059_v18 = vld [vmem:[%s3080_s11 + $0x8] sm:$0xff] }
0x127e   :  { %v1845_v35 = vpop.permute.xlu0 %1844 }
0x127f   :  { %v1847_v37 = vmul.f32 %v1845_v35, %v1839_v26 }
0x1281   :  { %1849 = vrot.lane.b32.xlu0 %v1847_v37, %s2476_s7 }
0x12ac   :  { %v1949_v28 = vpop.permute.xlu2 %1948 }
0x12ad   :  { %v1953_v25 = vadd.f32 %v1949_v28, %v1933_v27 }
0x12af   :  { %2365 = vtanh.f32 %v1953_v25 }
0x12b5   :  { %v2366_v29 = vpop.eup %2365 }
0x12b6   :  { %1960 = vrot.lane.b32.xlu2 %v2366_v29, %s2475_s2 }
0x12db   :  { %v1947_v58 = vpop.permute.xlu1 %1946 }
0x12dc   :  { %v1952_v32 = vadd.f32 %v1947_v58, %v1932_v31 }
0x12de   :  { %2367 = vtanh.f32 %v1952_v32 }
0x12e4   :  { %v2368_v33 = vpop.eup %2367 }
0x12e5   :  { %1958 = vrot.lane.b32.xlu1 %v2368_v33, %s2475_s2 }
0x12f3   :  { %v1850_v14 = vpop.permute.xlu0 %1849 }
0x12f4   :  { %v1852_v43 = vadd.f32 %v1850_v14, %v1842_v39 }
0x12f6   :  { %2369 = vtanh.f32 %v1852_v43 }
0x12fc   :  { %v2370_v45 = vpop.eup %2369 }
0x12fd   :  { %1855 = vrot.lane.b32.xlu0 %v2370_v45, %s2475_s2 }
0x1310   :  { %v1961_v46 = vpop.permute.xlu2 %1960 }
0x1311   :  { %v1965_v47 = vmul.f32 %v1961_v46, %v3026_v6 }
0x1313   :  { %v1969_v20 = vrot.slane %v1965_v47, 6 }
0x1357   :  { %v1959_v36 = vpop.permute.xlu1 %1958 }
0x1358   :  { %v1964_v10 = vmul.f32 %v1959_v36, %v1907_v17  ;;  %v2060_v17 = vld [vmem:[%s3080_s11 + $0x10] sm:$0xff] }
0x1359   :  { %2084 = vmatpush.msra.mxu2 %v2060_v17 }
0x135a   :  { %v1968_v48 = vrot.slane %v1964_v10, 7 }
0x135b   :  { %2085 = vmatpush.msra.mxu2 %v2059_v18 }
0x135c   :  { %v1970_v49 = vsel %vm413_vm5, %v1969_v20, %v1968_v48 }
0x135d   :  { %1971 = vrot.lane.b32.xlu1 %v1970_v49, %s2476_s7  ;;  %2086 = vmatpush.msra.mxu2 %v2058_v21 }
0x136f   :  { %v1856_v3 = vpop.permute.xlu0 %1855 }
0x1370   :  { %v1858_v51 = vmul.f32 %v1856_v3, %v1839_v26 }
0x1372   :  { %1996 = vrot.lane.b32.xlu2 %v1858_v51, %s2476_s7 }
0x13cc   :  { %v1997_v15 = vpop.permute.xlu2 %1996 }
0x13cd   :  { %2172 = vmatmul.msk.f32.vlgmr.msra.gmra.mxu1 %vm434_vm12, %v1997_v15 }
0x13cf   :  { %v1972_v50 = vpop.permute.xlu1 %1971 }
0x13d0   :  { %2171 = vmatmul.msk.f32.vlgmr.msra.gmra.mxu0 %vm434_vm12, %v1972_v50 }
0x144a   :  { %v2017_v41 = vpop.f32.mrf.mxu1 }
0x144d   :  { %v1992_v38 = vpop.f32.mrf.mxu0 }
0x144e   :  { %v1993_v52 = vadd.f32 %v2960_v12, %v1992_v38 }
0x1450   :  { %v2020_v42 = vadd.f32 %v2017_v41, %v1993_v52 }
0x1452   :  { %2371 = vtanh.f32 %v2020_v42  ;;  %v2173_v13 = vmul.f32 -1.442695, %v2020_v42 }
0x1454   :  { %2373 = vpow2.f32 %v2173_v13 }
0x1458   :  { %v2372_v34 = vpop.eup %2371 }
0x1459   :  { %2043 = vrot.lane.b32.xlu0 %v2372_v34, %s2475_s2 }
0x145a   :  { %v2374_v54 = vpop.eup %2373 }
0x145b   :  { %v2024_v8 = vadd.f32 1.0, %v2374_v54 }
0x145d   :  { %2375 = vrcp.f32 %v2024_v8  ;;  %v2036_v56 = vand.u32 2147483648, %v2024_v8  ;;  %vm2030_vm6 = vweird.f32 %v2024_v8  ;;  %v2034_v12 = vand.u32 2147483647, %v2024_v8 }
0x145f   :  { %v2037_v57 = vor.u32 1.1754944e-38, %v2036_v56  ;;  %vm2035_vm8 = vcmp.eq.f32.partialorder %v2034_v12, 8.507059e+37 }
0x1463   :  { %v2376_v40 = vpop.eup %2375 }
0x1464   :  { %v2026_v6 = vmul.f32 %v2376_v40, %v2024_v8  ;;  %vm2031_vm5 = vweird.f32 %v2376_v40 }
0x1465   :  { %vm2032_vm7 = vmor %vm2030_vm6, %vm2031_vm5 }
0x1466   :  { %v2027_v63 = vsub.f32 1.0, %v2026_v6 }
0x1468   :  { %v2028_v22 = vmul.f32 %v2376_v40, %v2027_v63 }
0x146a   :  { %v2029_v61 = vadd.f32 %v2376_v40, %v2028_v22 }
0x146c   :  { %v2033_v9 = vsel %vm2032_vm7, %v2376_v40, %v2029_v61 }
0x146d   :  { %v2038_v0 = vsel %vm2035_vm8, %v2037_v57, %v2033_v9 }
0x146e   :  { %v2041_v23 = vmul.f32 %v2038_v0, %v1852_v43 }
0x14cb   :  { %v2044_v62 = vpop.permute.xlu0 %2043 }
0x14cc   :  { %v2046_v1 = vmul.f32 %v2044_v62, %v2038_v0 }
0x14ce   :  { %2048 = vrot.lane.b32.xlu1 %v2046_v1, %s2476_s7 }
0x1540   :  { %v2049_v2 = vpop.permute.xlu1 %2048 }
0x1541   :  { %v2051_v4 = vadd.f32 %v2049_v2, %v2041_v23 }
0x1543   :  { %2377 = vtanh.f32 %v2051_v4 }
0x1549   :  { %v2378_v11 = vpop.eup %2377 }
0x154a   :  { %2054 = vrot.lane.b32.xlu2 %v2378_v11, %s2475_s2  ;;  %s2100_s2 = sshll.u32 %s3082_s13, 4  ;;  %s2101_s2 = int_to_ptr.hbm [resolvable:$true] %s2100_s2 }
0x15a4   :  { %v2055_v55 = vpop.permute.xlu2 %2054 }
0x15a5   :  { %v2057_v19 = vmul.f32 %v2055_v55, %v2038_v0 }
0x15a7   :  { %2067 = vrot.lane.b32.xlu0 %v2057_v19, %s2476_s7 }
0x1619   :  { %v2068_v24 = vpop.permute.xlu0 %2067 }
0x161a   :  { %2174 = vmatmul.msk.f32.vlgmr.msra.gmra.mxu2 %vm434_vm12, %v2068_v24 }
0x169d   :  { %v2088_v5 = vpop.f32.mrf.mxu2 }
0x169e   :  { %v2089_v44 = vadd.f32 %v2186_v59, %v2088_v5 }
0x16a0   :  { %2092 = vst.msk [vmem:[#allocation7] sm:$0x3] %vm2091_vm9, %v2089_v44 }
0x16a1   :  { %2103 = dma.vmem_to_hbm [thread:$0]  %s2099_s3, 32, %s2101_s2, [#allocation4]  }
0x16a2   :  { %2468 = dma.done.wait [#allocation4], 32  }
0x16a3   :  { %2469 = vsyncadd [#allocation4], 4294967264 }
0x16a4   :  { %2108 = vsyncpa [#allocation3], 1 }
0x16a5   :  { %2109 = vsyncpa [#allocation6], 1 }
0x16a6   :  { %2110 = vsyncpa [#allocation4], 1 }

</bundles_post_ra>
